<compile_context>
chip_gen: v6e
topology: v6e:2x2x1
jax: 0.10.0
libtpu: 0.0.40
codegen_flags: <defaults>
</compile_context>

<pallas_src>
import functools

import jax
import jax.numpy as jnp
import numpy as np
from jax.experimental import pallas as pl
from jax.experimental.pallas import tpu as pltpu


# ----------------------------- fused Pallas kernel ---------------------------
def gconv_net_kernel(obj_in_ref, pred_in_ref,
                     gs_ref, go_ref, ss_ref, so_ref,
                     w1a_s_ref, w1a_p_ref, w1a_o_ref, b1a_ref,
                     w1b_s_ref, w1b_p_ref, w1b_o_ref,
                     b1b_s_ref, b1b_p_ref, b1b_o_ref,
                     w2a_ref, b2a_ref, w2b_ref, b2b_ref,
                     obj_out_ref, pred_out_ref,
                     *, compute_dtype):
    layer = pl.program_id(0)

    # Layer 0: seed the VMEM-resident output blocks with the network inputs.
    @pl.when(layer == 0)
    def _():
        obj_out_ref[...] = obj_in_ref[...]
        pred_out_ref[...] = pred_in_ref[...]

    cd = compute_dtype
    obj = obj_out_ref[...].astype(cd)        # (O, D)  carried across layers
    pred = pred_out_ref[...].astype(cd)      # (T, D)

    # Gather obj_vecs[s_idx] / obj_vecs[o_idx] via precomputed one-hot matrices (exact
    # row picking, so a cd output is exact). Weights/constants are already stored in cd.
    cur_s = jnp.dot(gs_ref[...], obj, preferred_element_type=cd)   # (T, D)
    cur_o = jnp.dot(go_ref[...], obj, preferred_element_type=cd)   # (T, D)

    # net1 first Linear: W1a pre-split into three row blocks -> no concat of inputs.
    h1 = (jnp.dot(cur_s, w1a_s_ref[...], preferred_element_type=jnp.float32)
          + jnp.dot(pred, w1a_p_ref[...], preferred_element_type=jnp.float32)
          + jnp.dot(cur_o, w1a_o_ref[...], preferred_element_type=jnp.float32)
          + b1a_ref[...])
    h1 = jnp.maximum(h1, 0.0).astype(cd)                            # (T, H)

    # net1 second Linear: W1b pre-split into its three column blocks -> no (T, 2H+Dout)
    # intermediate, lane-dense outputs, three independent matmuls.
    new_s = jnp.maximum(jnp.dot(h1, w1b_s_ref[...],
                                preferred_element_type=jnp.float32) + b1b_s_ref[...], 0.0)
    new_p = jnp.maximum(jnp.dot(h1, w1b_p_ref[...],
                                preferred_element_type=jnp.float32) + b1b_p_ref[...], 0.0)
    new_o = jnp.maximum(jnp.dot(h1, w1b_o_ref[...],
                                preferred_element_type=jnp.float32) + b1b_o_ref[...], 0.0)

    # scatter_add pooling with 'avg' normalization folded into the scatter matrices.
    pooled = (jnp.dot(ss_ref[...], new_s.astype(cd), preferred_element_type=jnp.float32)
              + jnp.dot(so_ref[...], new_o.astype(cd), preferred_element_type=jnp.float32))

    # net2: Linear -> ReLU -> Linear -> ReLU
    g1 = jnp.maximum(jnp.dot(pooled.astype(cd), w2a_ref[...],
                             preferred_element_type=jnp.float32) + b2a_ref[...], 0.0)
    new_obj = jnp.maximum(jnp.dot(g1.astype(cd), w2b_ref[...],
                                  preferred_element_type=jnp.float32) + b2b_ref[...], 0.0)

    obj_out_ref[...] = new_obj.astype(obj_out_ref.dtype)
    pred_out_ref[...] = new_p.astype(pred_out_ref.dtype)


# ----------------------------- wrapper (glue) --------------------------------
@functools.partial(jax.jit,
                   static_argnames=("H", "Dout", "compute_dtype", "vmem_limit_bytes"))
def graph_triple_conv_net(obj_vecs, pred_vecs, edges, stacked_params, *,
                          H, Dout, compute_dtype=jnp.bfloat16, vmem_limit_bytes=None):
    O, Din = obj_vecs.shape
    T = pred_vecs.shape[0]
    # Carried-output fused-layer design requires output_dim == input_dim (output_dim=None).
    assert Dout == Din

    (w1a, b1a, w1b, b1b, w2a, b2a, w2b, b2b) = stacked_params
    L = w1a.shape[0]
    cd = compute_dtype

    # --- edge-only preprocessing, computed once for all layers (hoisted out of kernel) ---
    s_idx = edges[:, 0].astype(jnp.int32)
    o_idx = edges[:, 1].astype(jnp.int32)
    obj_iota = jnp.arange(O, dtype=jnp.int32)[None, :]
    s_oh = (s_idx[:, None] == obj_iota).astype(jnp.float32)          # (T, O) gather matrix
    o_oh = (o_idx[:, None] == obj_iota).astype(jnp.float32)          # (T, O)
    counts = s_oh.sum(axis=0) + o_oh.sum(axis=0)                     # (O,)
    inv_counts = 1.0 / jnp.maximum(counts, 1.0)                      # 'avg' pooling
    gather_s = s_oh.astype(cd)
    gather_o = o_oh.astype(cd)
    scatter_s = (s_oh.T * inv_counts[:, None]).astype(cd)            # (O, T) scatter + norm
    scatter_o = (o_oh.T * inv_counts[:, None]).astype(cd)            # (O, T)

    # --- weight preprocessing: split + cast to compute_dtype ONCE in the wrapper ---
    w1a_s = w1a[:, 0:Din, :].astype(cd)                              # (L, Din, H)
    w1a_p = w1a[:, Din:2 * Din, :].astype(cd)
    w1a_o = w1a[:, 2 * Din:3 * Din, :].astype(cd)
    w1b_s = w1b[:, :, 0:H].astype(cd)                                # (L, H, H)
    w1b_p = w1b[:, :, H:H + Dout].astype(cd)                         # (L, H, Dout)
    w1b_o = w1b[:, :, H + Dout:2 * H + Dout].astype(cd)              # (L, H, H)
    b1b_s = b1b[:, :, 0:H]                                           # biases stay f32
    b1b_p = b1b[:, :, H:H + Dout]
    b1b_o = b1b[:, :, H + Dout:2 * H + Dout]
    w2a_c = w2a.astype(cd)
    w2b_c = w2b.astype(cd)

    def const_spec(shape):
        n = len(shape)
        return pl.BlockSpec(shape, lambda l, _n=n: (0,) * _n)

    def layer_spec(full_shape):
        # stacked (L, a, b): stream one layer's slab per grid step, squeeze the layer dim.
        return pl.BlockSpec((None,) + tuple(full_shape[1:]), lambda l: (l, 0, 0))

    inputs = [obj_vecs, pred_vecs,
              gather_s, gather_o, scatter_s, scatter_o,
              w1a_s, w1a_p, w1a_o, b1a,
              w1b_s, w1b_p, w1b_o, b1b_s, b1b_p, b1b_o,
              w2a_c, b2a, w2b_c, b2b]
    in_specs = ([const_spec(x.shape) for x in inputs[:6]]
                + [layer_spec(x.shape) for x in inputs[6:]])

    kernel = functools.partial(gconv_net_kernel, compute_dtype=compute_dtype)

    compiler_kwargs = dict(dimension_semantics=("arbitrary",))  # layer loop is sequential
    if vmem_limit_bytes is not None:
        # Raise the scoped VMEM limit once weights grow (e.g. H=512 production sizes).
        compiler_kwargs["vmem_limit_bytes"] = vmem_limit_bytes

    return pl.pallas_call(
        kernel,
        grid=(L,),
        in_specs=in_specs,
        out_specs=(const_spec((O, Dout)), const_spec((T, Dout))),
        out_shape=(jax.ShapeDtypeStruct((O, Dout), jnp.float32),
                   jax.ShapeDtypeStruct((T, Dout), jnp.float32)),
        compiler_params=pltpu.CompilerParams(**compiler_kwargs),
    )(*inputs)


# --------------------------- pure-JAX reference -------------------------------
def reference_net(obj, pred, edges, layer_params, *, H, Dout):
    s_idx = edges[:, 0]
    o_idx = edges[:, 1]
    for (w1a, b1a, w1b, b1b, w2a, b2a, w2b, b2b) in layer_params:
        cs, co = obj[s_idx], obj[o_idx]
        t = jnp.concatenate([cs, pred, co], axis=1)
        h1 = jax.nn.relu(t @ w1a + b1a)
        h2 = jax.nn.relu(h1 @ w1b + b1b)
        ns, npred, no = h2[:, :H], h2[:, H:H + Dout], h2[:, H + Dout:2 * H + Dout]
        O = obj.shape[0]
        pooled = jnp.zeros((O, H), jnp.float32).at[s_idx].add(ns).at[o_idx].add(no)
        counts = jnp.zeros((O,), jnp.float32).at[s_idx].add(1.0).at[o_idx].add(1.0)
        counts = jnp.maximum(counts, 1.0)
        pooled = pooled / counts[:, None]
        g1 = jax.nn.relu(pooled @ w2a + b2a)
        obj = jax.nn.relu(g1 @ w2b + b2b)
        pred = npred
    return obj, pred


# ------------------------------ param init -----------------------------------
def init_layer_params(key, Din, H, Dout):
    ks = jax.random.split(key, 4)

    def lin(kw, fan_in, fan_out):
        scale = np.sqrt(2.0 / fan_in)   # kaiming_normal (matches _init_weights)
        return jax.random.normal(kw, (fan_in, fan_out), jnp.float32) * scale

    w1a = lin(ks[0], 3 * Din, H);       b1a = jnp.zeros((1, H), jnp.float32)
    w1b = lin(ks[1], H, 2 * H + Dout);  b1b = jnp.zeros((1, 2 * H + Dout), jnp.float32)
    w2a = lin(ks[2], H, H);             b2a = jnp.zeros((1, H), jnp.float32)
    w2b = lin(ks[3], H, Dout);          b2b = jnp.zeros((1, Dout), jnp.float32)
    return (w1a, b1a, w1b, b1b, w2a, b2a, w2b, b2b)


def stack_layer_params(layer_params):
    # list of per-layer tuples -> tuple of stacked arrays with leading L axis
    return tuple(jnp.stack(ps, axis=0) for ps in zip(*layer_params))


# --------------------------------- main ---------------------------------------
if __name__ == "__main__":
    O, T = 16, 32          # num objects / num triples (multiples of 16 for bf16 tiles)
    Din = 128              # input_dim == output_dim (output_dim=None); lane-dense
    H = 128                # hidden_dim (MXU/lane-aligned stand-in for 512)
    num_layers = 5         # module default

    key = jax.random.PRNGKey(0)
    k_obj, k_pred, k_edges, k_params = jax.random.split(key, 4)

    obj_vecs = jax.random.normal(k_obj, (O, Din), jnp.float32)
    pred_vecs = jax.random.normal(k_pred, (T, Din), jnp.float32)
    edges = jax.random.randint(k_edges, (T, 2), 0, O, dtype=jnp.int32)

    layer_params = [init_layer_params(k, Din, H, Din)
                    for k in jax.random.split(k_params, num_layers)]
    stacked_params = stack_layer_params(layer_params)

    obj_ref, pred_ref = reference_net(obj_vecs, pred_vecs, edges,
                                      layer_params, H=H, Dout=Din)
    obj_ref = np.asarray(obj_ref)
    pred_ref = np.asarray(pred_ref)

    # 1) f32 compute path: exact-ish check against the pure-JAX reference.
    obj_f32, pred_f32 = graph_triple_conv_net(obj_vecs, pred_vecs, edges, stacked_params,
                                              H=H, Dout=Din, compute_dtype=jnp.float32)
    obj_f32 = np.asarray(jax.block_until_ready(obj_f32))
    pred_f32 = np.asarray(jax.block_until_ready(pred_f32))
    np.testing.assert_allclose(obj_f32, obj_ref, rtol=1e-3, atol=1e-3)
    np.testing.assert_allclose(pred_f32, pred_ref, rtol=1e-3, atol=1e-3)

    # 2) bf16 production path (default): halves weight DMA, full MXU rate on v6e/v7x.
    obj_bf, pred_bf = graph_triple_conv_net(obj_vecs, pred_vecs, edges, stacked_params,
                                            H=H, Dout=Din)   # compute_dtype=bf16 default
    obj_bf = np.asarray(jax.block_until_ready(obj_bf), dtype=np.float32)
    pred_bf = np.asarray(jax.block_until_ready(pred_bf), dtype=np.float32)

    def rel_err(a, b):
        return np.linalg.norm(a - b) / max(np.linalg.norm(b), 1e-6)

    assert np.all(np.isfinite(obj_bf)) and np.all(np.isfinite(pred_bf))
    assert rel_err(obj_bf, obj_ref) < 0.1, rel_err(obj_bf, obj_ref)
    assert rel_err(pred_bf, pred_ref) < 0.1, rel_err(pred_bf, pred_ref)

    print("KERNEL_OK")
</pallas_src>

<mosaic_0001>
module attributes {stable_mosaic.version = 11 : i64} {
  func.func @gconv_net_kernel(%arg0: i32, %arg1: memref<16x128xf32, #tpu.memory_space<vmem>>, %arg2: memref<32x128xf32, #tpu.memory_space<vmem>>, %arg3: memref<32x16xf32, #tpu.memory_space<vmem>>, %arg4: memref<32x16xf32, #tpu.memory_space<vmem>>, %arg5: memref<16x32xf32, #tpu.memory_space<vmem>>, %arg6: memref<16x32xf32, #tpu.memory_space<vmem>>, %arg7: memref<1x128x128xf32, #tpu.memory_space<vmem>>, %arg8: memref<1x128x128xf32, #tpu.memory_space<vmem>>, %arg9: memref<1x128x128xf32, #tpu.memory_space<vmem>>, %arg10: memref<1x1x128xf32, #tpu.memory_space<vmem>>, %arg11: memref<1x128x128xf32, #tpu.memory_space<vmem>>, %arg12: memref<1x128x128xf32, #tpu.memory_space<vmem>>, %arg13: memref<1x128x128xf32, #tpu.memory_space<vmem>>, %arg14: memref<1x1x128xf32, #tpu.memory_space<vmem>>, %arg15: memref<1x1x128xf32, #tpu.memory_space<vmem>>, %arg16: memref<1x1x128xf32, #tpu.memory_space<vmem>>, %arg17: memref<1x128x128xf32, #tpu.memory_space<vmem>>, %arg18: memref<1x1x128xf32, #tpu.memory_space<vmem>>, %arg19: memref<1x128x128xf32, #tpu.memory_space<vmem>>, %arg20: memref<1x1x128xf32, #tpu.memory_space<vmem>>, %arg21: memref<16x128xf32, #tpu.memory_space<vmem>>, %arg22: memref<32x128xf32, #tpu.memory_space<vmem>>) attributes {dimension_semantics = [#tpu.dimension_semantics<arbitrary>], iteration_bounds = array<i64: 5>, scalar_prefetch = 0 : i64, scratch_operands = 0 : i64, tpu.core_type = #tpu.core_type<tc>, window_params = [{pipeline_mode = #tpu.pipeline_mode<synchronous>, transform_indices = @transform_0, window_bounds = array<i64: 16, 128>}, {pipeline_mode = #tpu.pipeline_mode<synchronous>, transform_indices = @transform_1, window_bounds = array<i64: 32, 128>}, {pipeline_mode = #tpu.pipeline_mode<synchronous>, transform_indices = @transform_2, window_bounds = array<i64: 32, 16>}, {pipeline_mode = #tpu.pipeline_mode<synchronous>, transform_indices = @transform_3, window_bounds = array<i64: 32, 16>}, {pipeline_mode = #tpu.pipeline_mode<synchronous>, transform_indices = @transform_4, window_bounds = array<i64: 16, 32>}, {pipeline_mode = #tpu.pipeline_mode<synchronous>, transform_indices = @transform_5, window_bounds = array<i64: 16, 32>}, {transform_indices = @transform_6, window_bounds = array<i64: 1, 128, 128>}, {transform_indices = @transform_7, window_bounds = array<i64: 1, 128, 128>}, {transform_indices = @transform_8, window_bounds = array<i64: 1, 128, 128>}, {transform_indices = @transform_9, window_bounds = array<i64: 1, 1, 128>}, {transform_indices = @transform_10, window_bounds = array<i64: 1, 128, 128>}, {transform_indices = @transform_11, window_bounds = array<i64: 1, 128, 128>}, {transform_indices = @transform_12, window_bounds = array<i64: 1, 128, 128>}, {transform_indices = @transform_13, window_bounds = array<i64: 1, 1, 128>}, {transform_indices = @transform_14, window_bounds = array<i64: 1, 1, 128>}, {transform_indices = @transform_15, window_bounds = array<i64: 1, 1, 128>}, {transform_indices = @transform_16, window_bounds = array<i64: 1, 128, 128>}, {transform_indices = @transform_17, window_bounds = array<i64: 1, 1, 128>}, {transform_indices = @transform_18, window_bounds = array<i64: 1, 128, 128>}, {transform_indices = @transform_19, window_bounds = array<i64: 1, 1, 128>}, {pipeline_mode = #tpu.pipeline_mode<synchronous>, transform_indices = @transform_20, window_bounds = array<i64: 16, 128>}, {pipeline_mode = #tpu.pipeline_mode<synchronous>, transform_indices = @transform_21, window_bounds = array<i64: 32, 128>}]} {
    %c0_i32 = arith.constant 0 : i32
    %0 = arith.cmpi eq, %arg0, %c0_i32 : i32
    %1 = arith.extui %0 : i1 to i32
    %c0_i32_0 = arith.constant 0 : i32
    %2 = arith.cmpi ne, %1, %c0_i32_0 : i32
    scf.if %2 {
      %c0_75 = arith.constant 0 : index
      %c0_76 = arith.constant 0 : index
      %78 = vector.load %arg1[%c0_75, %c0_76] : memref<16x128xf32, #tpu.memory_space<vmem>>, vector<16x128xf32>
      %c0_77 = arith.constant 0 : index
      %c0_78 = arith.constant 0 : index
      %79 = vector.load %arg21[%c0_77, %c0_78] : memref<16x128xf32, #tpu.memory_space<vmem>>, vector<16x128xf32>
      tpu.vector_store %arg21[%c0_77, %c0_78], %78 {strides = array<i32>} : memref<16x128xf32, #tpu.memory_space<vmem>>, vector<16x128xf32>,
      %c0_79 = arith.constant 0 : index
      %c0_80 = arith.constant 0 : index
      %80 = vector.load %arg2[%c0_79, %c0_80] : memref<32x128xf32, #tpu.memory_space<vmem>>, vector<32x128xf32>
      %c0_81 = arith.constant 0 : index
      %c0_82 = arith.constant 0 : index
      %81 = vector.load %arg22[%c0_81, %c0_82] : memref<32x128xf32, #tpu.memory_space<vmem>>, vector<32x128xf32>
      tpu.vector_store %arg22[%c0_81, %c0_82], %80 {strides = array<i32>} : memref<32x128xf32, #tpu.memory_space<vmem>>, vector<32x128xf32>,
    } else {
    }
    %c0 = arith.constant 0 : index
    %c0_1 = arith.constant 0 : index
    %3 = vector.load %arg21[%c0, %c0_1] : memref<16x128xf32, #tpu.memory_space<vmem>>, vector<16x128xf32>
    %c0_2 = arith.constant 0 : index
    %c0_3 = arith.constant 0 : index
    %4 = vector.load %arg22[%c0_2, %c0_3] : memref<32x128xf32, #tpu.memory_space<vmem>>, vector<32x128xf32>
    %c0_4 = arith.constant 0 : index
    %c0_5 = arith.constant 0 : index
    %5 = vector.load %arg3[%c0_4, %c0_5] : memref<32x16xf32, #tpu.memory_space<vmem>>, vector<32x16xf32>
    %cst = arith.constant dense<0.000000e+00> : vector<32x128xf32>
    %6 = tpu.matmul %5, %3, %cst {dimension_numbers = #tpu.dot_dimension_numbers<[1], [0], [0], [1], [0, 0, 1, 1], [], []>} : vector<32x16xf32>, vector<16x128xf32>, vector<32x128xf32> -> vector<32x128xf32>
    %c0_6 = arith.constant 0 : index
    %c0_7 = arith.constant 0 : index
    %7 = vector.load %arg4[%c0_6, %c0_7] : memref<32x16xf32, #tpu.memory_space<vmem>>, vector<32x16xf32>
    %cst_8 = arith.constant dense<0.000000e+00> : vector<32x128xf32>
    %8 = tpu.matmul %7, %3, %cst_8 {dimension_numbers = #tpu.dot_dimension_numbers<[1], [0], [0], [1], [0, 0, 1, 1], [], []>} : vector<32x16xf32>, vector<16x128xf32>, vector<32x128xf32> -> vector<32x128xf32>
    %c0_9 = arith.constant 0 : index
    %c0_10 = arith.constant 0 : index
    %c0_11 = arith.constant 0 : index
    %9 = vector.load %arg7[%c0_9, %c0_10, %c0_11] : memref<1x128x128xf32, #tpu.memory_space<vmem>>, vector<1x128x128xf32>
    %10 = vector.shape_cast %9 : vector<1x128x128xf32> to vector<128x128xf32>
    %cst_12 = arith.constant dense<0.000000e+00> : vector<32x128xf32>
    %11 = tpu.matmul %6, %10, %cst_12 {dimension_numbers = #tpu.dot_dimension_numbers<[1], [0], [0], [1], [0, 0, 1, 1], [], []>} : vector<32x128xf32>, vector<128x128xf32>, vector<32x128xf32> -> vector<32x128xf32>
    %c0_13 = arith.constant 0 : index
    %c0_14 = arith.constant 0 : index
    %c0_15 = arith.constant 0 : index
    %12 = vector.load %arg8[%c0_13, %c0_14, %c0_15] : memref<1x128x128xf32, #tpu.memory_space<vmem>>, vector<1x128x128xf32>
    %13 = vector.shape_cast %12 : vector<1x128x128xf32> to vector<128x128xf32>
    %cst_16 = arith.constant dense<0.000000e+00> : vector<32x128xf32>
    %14 = tpu.matmul %4, %13, %cst_16 {dimension_numbers = #tpu.dot_dimension_numbers<[1], [0], [0], [1], [0, 0, 1, 1], [], []>} : vector<32x128xf32>, vector<128x128xf32>, vector<32x128xf32> -> vector<32x128xf32>
    %15 = arith.addf %11, %14 : vector<32x128xf32>
    %c0_17 = arith.constant 0 : index
    %c0_18 = arith.constant 0 : index
    %c0_19 = arith.constant 0 : index
    %16 = vector.load %arg9[%c0_17, %c0_18, %c0_19] : memref<1x128x128xf32, #tpu.memory_space<vmem>>, vector<1x128x128xf32>
    %17 = vector.shape_cast %16 : vector<1x128x128xf32> to vector<128x128xf32>
    %cst_20 = arith.constant dense<0.000000e+00> : vector<32x128xf32>
    %18 = tpu.matmul %8, %17, %cst_20 {dimension_numbers = #tpu.dot_dimension_numbers<[1], [0], [0], [1], [0, 0, 1, 1], [], []>} : vector<32x128xf32>, vector<128x128xf32>, vector<32x128xf32> -> vector<32x128xf32>
    %19 = arith.addf %15, %18 : vector<32x128xf32>
    %c0_21 = arith.constant 0 : index
    %c0_22 = arith.constant 0 : index
    %c0_23 = arith.constant 0 : index
    %20 = vector.load %arg10[%c0_21, %c0_22, %c0_23] : memref<1x1x128xf32, #tpu.memory_space<vmem>>, vector<1x1x128xf32>
    %21 = vector.shape_cast %20 : vector<1x1x128xf32> to vector<1x128xf32>
    %22 = vector.broadcast %21 : vector<1x128xf32> to vector<32x128xf32>
    %23 = arith.addf %19, %22 : vector<32x128xf32>
    %cst_24 = arith.constant 0.000000e+00 : f32
    %24 = vector.broadcast %cst_24 : f32 to vector<32x128xf32>
    %25 = arith.maximumf %23, %24 : vector<32x128xf32>
    %c0_25 = arith.constant 0 : index
    %c0_26 = arith.constant 0 : index
    %c0_27 = arith.constant 0 : index
    %26 = vector.load %arg11[%c0_25, %c0_26, %c0_27] : memref<1x128x128xf32, #tpu.memory_space<vmem>>, vector<1x128x128xf32>
    %27 = vector.shape_cast %26 : vector<1x128x128xf32> to vector<128x128xf32>
    %cst_28 = arith.constant dense<0.000000e+00> : vector<32x128xf32>
    %28 = tpu.matmul %25, %27, %cst_28 {dimension_numbers = #tpu.dot_dimension_numbers<[1], [0], [0], [1], [0, 0, 1, 1], [], []>} : vector<32x128xf32>, vector<128x128xf32>, vector<32x128xf32> -> vector<32x128xf32>
    %c0_29 = arith.constant 0 : index
    %c0_30 = arith.constant 0 : index
    %c0_31 = arith.constant 0 : index
    %29 = vector.load %arg14[%c0_29, %c0_30, %c0_31] : memref<1x1x128xf32, #tpu.memory_space<vmem>>, vector<1x1x128xf32>
    %30 = vector.shape_cast %29 : vector<1x1x128xf32> to vector<1x128xf32>
    %31 = vector.broadcast %30 : vector<1x128xf32> to vector<32x128xf32>
    %32 = arith.addf %28, %31 : vector<32x128xf32>
    %cst_32 = arith.constant 0.000000e+00 : f32
    %33 = vector.broadcast %cst_32 : f32 to vector<32x128xf32>
    %34 = arith.maximumf %32, %33 : vector<32x128xf32>
    %c0_33 = arith.constant 0 : index
    %c0_34 = arith.constant 0 : index
    %c0_35 = arith.constant 0 : index
    %35 = vector.load %arg12[%c0_33, %c0_34, %c0_35] : memref<1x128x128xf32, #tpu.memory_space<vmem>>, vector<1x128x128xf32>
    %36 = vector.shape_cast %35 : vector<1x128x128xf32> to vector<128x128xf32>
    %cst_36 = arith.constant dense<0.000000e+00> : vector<32x128xf32>
    %37 = tpu.matmul %25, %36, %cst_36 {dimension_numbers = #tpu.dot_dimension_numbers<[1], [0], [0], [1], [0, 0, 1, 1], [], []>} : vector<32x128xf32>, vector<128x128xf32>, vector<32x128xf32> -> vector<32x128xf32>
    %c0_37 = arith.constant 0 : index
    %c0_38 = arith.constant 0 : index
    %c0_39 = arith.constant 0 : index
    %38 = vector.load %arg15[%c0_37, %c0_38, %c0_39] : memref<1x1x128xf32, #tpu.memory_space<vmem>>, vector<1x1x128xf32>
    %39 = vector.shape_cast %38 : vector<1x1x128xf32> to vector<1x128xf32>
    %40 = vector.broadcast %39 : vector<1x128xf32> to vector<32x128xf32>
    %41 = arith.addf %37, %40 : vector<32x128xf32>
    %cst_40 = arith.constant 0.000000e+00 : f32
    %42 = vector.broadcast %cst_40 : f32 to vector<32x128xf32>
    %43 = arith.maximumf %41, %42 : vector<32x128xf32>
    %c0_41 = arith.constant 0 : index
    %c0_42 = arith.constant 0 : index
    %c0_43 = arith.constant 0 : index
    %44 = vector.load %arg13[%c0_41, %c0_42, %c0_43] : memref<1x128x128xf32, #tpu.memory_space<vmem>>, vector<1x128x128xf32>
    %45 = vector.shape_cast %44 : vector<1x128x128xf32> to vector<128x128xf32>
    %cst_44 = arith.constant dense<0.000000e+00> : vector<32x128xf32>
    %46 = tpu.matmul %25, %45, %cst_44 {dimension_numbers = #tpu.dot_dimension_numbers<[1], [0], [0], [1], [0, 0, 1, 1], [], []>} : vector<32x128xf32>, vector<128x128xf32>, vector<32x128xf32> -> vector<32x128xf32>
    %c0_45 = arith.constant 0 : index
    %c0_46 = arith.constant 0 : index
    %c0_47 = arith.constant 0 : index
    %47 = vector.load %arg16[%c0_45, %c0_46, %c0_47] : memref<1x1x128xf32, #tpu.memory_space<vmem>>, vector<1x1x128xf32>
    %48 = vector.shape_cast %47 : vector<1x1x128xf32> to vector<1x128xf32>
    %49 = vector.broadcast %48 : vector<1x128xf32> to vector<32x128xf32>
    %50 = arith.addf %46, %49 : vector<32x128xf32>
    %cst_48 = arith.constant 0.000000e+00 : f32
    %51 = vector.broadcast %cst_48 : f32 to vector<32x128xf32>
    %52 = arith.maximumf %50, %51 : vector<32x128xf32>
    %c0_49 = arith.constant 0 : index
    %c0_50 = arith.constant 0 : index
    %53 = vector.load %arg5[%c0_49, %c0_50] : memref<16x32xf32, #tpu.memory_space<vmem>>, vector<16x32xf32>
    %cst_51 = arith.constant dense<0.000000e+00> : vector<16x128xf32>
    %54 = tpu.matmul %53, %34, %cst_51 {dimension_numbers = #tpu.dot_dimension_numbers<[1], [0], [0], [1], [0, 0, 1, 1], [], []>} : vector<16x32xf32>, vector<32x128xf32>, vector<16x128xf32> -> vector<16x128xf32>
    %c0_52 = arith.constant 0 : index
    %c0_53 = arith.constant 0 : index
    %55 = vector.load %arg6[%c0_52, %c0_53] : memref<16x32xf32, #tpu.memory_space<vmem>>, vector<16x32xf32>
    %cst_54 = arith.constant dense<0.000000e+00> : vector<16x128xf32>
    %56 = tpu.matmul %55, %52, %cst_54 {dimension_numbers = #tpu.dot_dimension_numbers<[1], [0], [0], [1], [0, 0, 1, 1], [], []>} : vector<16x32xf32>, vector<32x128xf32>, vector<16x128xf32> -> vector<16x128xf32>
    %57 = arith.addf %54, %56 : vector<16x128xf32>
    %c0_55 = arith.constant 0 : index
    %c0_56 = arith.constant 0 : index
    %c0_57 = arith.constant 0 : index
    %58 = vector.load %arg17[%c0_55, %c0_56, %c0_57] : memref<1x128x128xf32, #tpu.memory_space<vmem>>, vector<1x128x128xf32>
    %59 = vector.shape_cast %58 : vector<1x128x128xf32> to vector<128x128xf32>
    %cst_58 = arith.constant dense<0.000000e+00> : vector<16x128xf32>
    %60 = tpu.matmul %57, %59, %cst_58 {dimension_numbers = #tpu.dot_dimension_numbers<[1], [0], [0], [1], [0, 0, 1, 1], [], []>} : vector<16x128xf32>, vector<128x128xf32>, vector<16x128xf32> -> vector<16x128xf32>
    %c0_59 = arith.constant 0 : index
    %c0_60 = arith.constant 0 : index
    %c0_61 = arith.constant 0 : index
    %61 = vector.load %arg18[%c0_59, %c0_60, %c0_61] : memref<1x1x128xf32, #tpu.memory_space<vmem>>, vector<1x1x128xf32>
    %62 = vector.shape_cast %61 : vector<1x1x128xf32> to vector<1x128xf32>
    %63 = vector.broadcast %62 : vector<1x128xf32> to vector<16x128xf32>
    %64 = arith.addf %60, %63 : vector<16x128xf32>
    %cst_62 = arith.constant 0.000000e+00 : f32
    %65 = vector.broadcast %cst_62 : f32 to vector<16x128xf32>
    %66 = arith.maximumf %64, %65 : vector<16x128xf32>
    %c0_63 = arith.constant 0 : index
    %c0_64 = arith.constant 0 : index
    %c0_65 = arith.constant 0 : index
    %67 = vector.load %arg19[%c0_63, %c0_64, %c0_65] : memref<1x128x128xf32, #tpu.memory_space<vmem>>, vector<1x128x128xf32>
    %68 = vector.shape_cast %67 : vector<1x128x128xf32> to vector<128x128xf32>
    %cst_66 = arith.constant dense<0.000000e+00> : vector<16x128xf32>
    %69 = tpu.matmul %66, %68, %cst_66 {dimension_numbers = #tpu.dot_dimension_numbers<[1], [0], [0], [1], [0, 0, 1, 1], [], []>} : vector<16x128xf32>, vector<128x128xf32>, vector<16x128xf32> -> vector<16x128xf32>
    %c0_67 = arith.constant 0 : index
    %c0_68 = arith.constant 0 : index
    %c0_69 = arith.constant 0 : index
    %70 = vector.load %arg20[%c0_67, %c0_68, %c0_69] : memref<1x1x128xf32, #tpu.memory_space<vmem>>, vector<1x1x128xf32>
    %71 = vector.shape_cast %70 : vector<1x1x128xf32> to vector<1x128xf32>
    %72 = vector.broadcast %71 : vector<1x128xf32> to vector<16x128xf32>
    %73 = arith.addf %69, %72 : vector<16x128xf32>
    %cst_70 = arith.constant 0.000000e+00 : f32
    %74 = vector.broadcast %cst_70 : f32 to vector<16x128xf32>
    %75 = arith.maximumf %73, %74 : vector<16x128xf32>
    %c0_71 = arith.constant 0 : index
    %c0_72 = arith.constant 0 : index
    %76 = vector.load %arg21[%c0_71, %c0_72] : memref<16x128xf32, #tpu.memory_space<vmem>>, vector<16x128xf32>
    tpu.vector_store %arg21[%c0_71, %c0_72], %75 {strides = array<i32>} : memref<16x128xf32, #tpu.memory_space<vmem>>, vector<16x128xf32>,
    %c0_73 = arith.constant 0 : index
    %c0_74 = arith.constant 0 : index
    %77 = vector.load %arg22[%c0_73, %c0_74] : memref<32x128xf32, #tpu.memory_space<vmem>>, vector<32x128xf32>
    tpu.vector_store %arg22[%c0_73, %c0_74], %43 {strides = array<i32>} : memref<32x128xf32, #tpu.memory_space<vmem>>, vector<32x128xf32>,
    return
  }
  func.func @transform_0(%arg0: i32) -> (i32, i32) {
    %c0_i32 = arith.constant 0 : i32
    %c0_i32_0 = arith.constant 0 : i32
    %c0_i32_1 = arith.constant 0 : i32
    return %c0_i32, %c0_i32_0 : i32, i32
  }
  func.func @transform_1(%arg0: i32) -> (i32, i32) {
    %c0_i32 = arith.constant 0 : i32
    %c0_i32_0 = arith.constant 0 : i32
    %c0_i32_1 = arith.constant 0 : i32
    return %c0_i32, %c0_i32_0 : i32, i32
  }
  func.func @transform_2(%arg0: i32) -> (i32, i32) {
    %c0_i32 = arith.constant 0 : i32
    %c0_i32_0 = arith.constant 0 : i32
    %c0_i32_1 = arith.constant 0 : i32
    return %c0_i32, %c0_i32_0 : i32, i32
  }
  func.func @transform_3(%arg0: i32) -> (i32, i32) {
    %c0_i32 = arith.constant 0 : i32
    %c0_i32_0 = arith.constant 0 : i32
    %c0_i32_1 = arith.constant 0 : i32
    return %c0_i32, %c0_i32_0 : i32, i32
  }
  func.func @transform_4(%arg0: i32) -> (i32, i32) {
    %c0_i32 = arith.constant 0 : i32
    %c0_i32_0 = arith.constant 0 : i32
    %c0_i32_1 = arith.constant 0 : i32
    return %c0_i32, %c0_i32_0 : i32, i32
  }
  func.func @transform_5(%arg0: i32) -> (i32, i32) {
    %c0_i32 = arith.constant 0 : i32
    %c0_i32_0 = arith.constant 0 : i32
    %c0_i32_1 = arith.constant 0 : i32
    return %c0_i32, %c0_i32_0 : i32, i32
  }
  func.func @transform_6(%arg0: i32) -> (i32, i32, i32) {
    %c0_i32 = arith.constant 0 : i32
    %c0_i32_0 = arith.constant 0 : i32
    %c0_i32_1 = arith.constant 0 : i32
    return %arg0, %c0_i32, %c0_i32_0 : i32, i32, i32
  }
  func.func @transform_7(%arg0: i32) -> (i32, i32, i32) {
    %c0_i32 = arith.constant 0 : i32
    %c0_i32_0 = arith.constant 0 : i32
    %c0_i32_1 = arith.constant 0 : i32
    return %arg0, %c0_i32, %c0_i32_0 : i32, i32, i32
  }
  func.func @transform_8(%arg0: i32) -> (i32, i32, i32) {
    %c0_i32 = arith.constant 0 : i32
    %c0_i32_0 = arith.constant 0 : i32
    %c0_i32_1 = arith.constant 0 : i32
    return %arg0, %c0_i32, %c0_i32_0 : i32, i32, i32
  }
  func.func @transform_9(%arg0: i32) -> (i32, i32, i32) {
    %c0_i32 = arith.constant 0 : i32
    %c0_i32_0 = arith.constant 0 : i32
    %c0_i32_1 = arith.constant 0 : i32
    return %arg0, %c0_i32, %c0_i32_0 : i32, i32, i32
  }
  func.func @transform_10(%arg0: i32) -> (i32, i32, i32) {
    %c0_i32 = arith.constant 0 : i32
    %c0_i32_0 = arith.constant 0 : i32
    %c0_i32_1 = arith.constant 0 : i32
    return %arg0, %c0_i32, %c0_i32_0 : i32, i32, i32
  }
  func.func @transform_11(%arg0: i32) -> (i32, i32, i32) {
    %c0_i32 = arith.constant 0 : i32
    %c0_i32_0 = arith.constant 0 : i32
    %c0_i32_1 = arith.constant 0 : i32
    return %arg0, %c0_i32, %c0_i32_0 : i32, i32, i32
  }
  func.func @transform_12(%arg0: i32) -> (i32, i32, i32) {
    %c0_i32 = arith.constant 0 : i32
    %c0_i32_0 = arith.constant 0 : i32
    %c0_i32_1 = arith.constant 0 : i32
    return %arg0, %c0_i32, %c0_i32_0 : i32, i32, i32
  }
  func.func @transform_13(%arg0: i32) -> (i32, i32, i32) {
    %c0_i32 = arith.constant 0 : i32
    %c0_i32_0 = arith.constant 0 : i32
    %c0_i32_1 = arith.constant 0 : i32
    return %arg0, %c0_i32, %c0_i32_0 : i32, i32, i32
  }
  func.func @transform_14(%arg0: i32) -> (i32, i32, i32) {
    %c0_i32 = arith.constant 0 : i32
    %c0_i32_0 = arith.constant 0 : i32
    %c0_i32_1 = arith.constant 0 : i32
    return %arg0, %c0_i32, %c0_i32_0 : i32, i32, i32
  }
  func.func @transform_15(%arg0: i32) -> (i32, i32, i32) {
    %c0_i32 = arith.constant 0 : i32
    %c0_i32_0 = arith.constant 0 : i32
    %c0_i32_1 = arith.constant 0 : i32
    return %arg0, %c0_i32, %c0_i32_0 : i32, i32, i32
  }
  func.func @transform_16(%arg0: i32) -> (i32, i32, i32) {
    %c0_i32 = arith.constant 0 : i32
    %c0_i32_0 = arith.constant 0 : i32
    %c0_i32_1 = arith.constant 0 : i32
    return %arg0, %c0_i32, %c0_i32_0 : i32, i32, i32
  }
  func.func @transform_17(%arg0: i32) -> (i32, i32, i32) {
    %c0_i32 = arith.constant 0 : i32
    %c0_i32_0 = arith.constant 0 : i32
    %c0_i32_1 = arith.constant 0 : i32
    return %arg0, %c0_i32, %c0_i32_0 : i32, i32, i32
  }
  func.func @transform_18(%arg0: i32) -> (i32, i32, i32) {
    %c0_i32 = arith.constant 0 : i32
    %c0_i32_0 = arith.constant 0 : i32
    %c0_i32_1 = arith.constant 0 : i32
    return %arg0, %c0_i32, %c0_i32_0 : i32, i32, i32
  }
  func.func @transform_19(%arg0: i32) -> (i32, i32, i32) {
    %c0_i32 = arith.constant 0 : i32
    %c0_i32_0 = arith.constant 0 : i32
    %c0_i32_1 = arith.constant 0 : i32
    return %arg0, %c0_i32, %c0_i32_0 : i32, i32, i32
  }
  func.func @transform_20(%arg0: i32) -> (i32, i32) {
    %c0_i32 = arith.constant 0 : i32
    %c0_i32_0 = arith.constant 0 : i32
    %c0_i32_1 = arith.constant 0 : i32
    return %c0_i32, %c0_i32_0 : i32, i32
  }
  func.func @transform_21(%arg0: i32) -> (i32, i32) {
    %c0_i32 = arith.constant 0 : i32
    %c0_i32_0 = arith.constant 0 : i32
    %c0_i32_1 = arith.constant 0 : i32
    return %c0_i32, %c0_i32_0 : i32, i32
  }
}

</mosaic_0001>

<bundles_post_ra>
// kernel: graph_triple_conv_net.1
= control target key start
LH: loop header
LB: loop body
LE: loop exit
PB: predicated region body
PF: predicated region fallthrough
CT: control target
= control target key end

     0   :  { %s3437_s0 = inlined_call_operand.vmem [shape: f32[16,128], index: 0, kind: input, shape index: {}]   ;;  %s3438_s1 = inlined_call_operand.vmem [shape: f32[32,128], index: 1, kind: input, shape index: {}]   ;;  %s3439_s2 = inlined_call_operand.vmem [shape: f32[32,16], index: 2, kind: input, shape index: {}]   ;;  %s3440_s3 = inlined_call_operand.vmem [shape: f32[32,16], index: 3, kind: input, shape index: {}]   ;;  %s3441_s4 = inlined_call_operand.vmem [shape: f32[16,32], index: 4, kind: input, shape index: {}]   ;;  %s3442_s5 = inlined_call_operand.vmem [shape: f32[16,32], index: 5, kind: input, shape index: {}]   ;;  %s3443_s6 = inlined_call_operand.vmem [shape: f32[5,128,128], index: 6, kind: input, shape index: {}]   ;;  %s3444_s7 = inlined_call_operand.vmem [shape: f32[5,128,128], index: 7, kind: input, shape index: {}]   ;;  %s3445_s8 = inlined_call_operand.vmem [shape: f32[5,128,128], index: 8, kind: input, shape index: {}]   ;;  %s3446_s9 = inlined_call_operand.vmem [shape: f32[5,1,128], index: 9, kind: input, shape index: {}]   ;;  %s3447_s10 = inlined_call_operand.vmem [shape: f32[5,128,128], index: 10, kind: input, shape index: {}]   ;;  %s3448_s11 = inlined_call_operand.vmem [shape: f32[5,128,128], index: 11, kind: input, shape index: {}]   ;;  %s3449_s12 = inlined_call_operand.vmem [shape: f32[5,128,128], index: 12, kind: input, shape index: {}]   ;;  %s3450_s13 = inlined_call_operand.vmem [shape: f32[5,1,128], index: 13, kind: input, shape index: {}]   ;;  %s3451_s14 = inlined_call_operand.vmem [shape: f32[5,1,128], index: 14, kind: input, shape index: {}]   ;;  %s3452_s15 = inlined_call_operand.vmem [shape: f32[5,1,128], index: 15, kind: input, shape index: {}]   ;;  %s3453_s16 = inlined_call_operand.vmem [shape: f32[5,128,128], index: 16, kind: input, shape index: {}]   ;;  %s3454_s17 = inlined_call_operand.vmem [shape: f32[5,1,128], index: 17, kind: input, shape index: {}]   ;;  %s3455_s18 = inlined_call_operand.vmem [shape: f32[5,128,128], index: 18, kind: input, shape index: {}]   ;;  %s3456_s19 = inlined_call_operand.vmem [shape: f32[5,1,128], index: 19, kind: input, shape index: {}]   ;;  %s3457_s20 = inlined_call_operand.hbm [shape: f32[16,128], index: 20, kind: output, shape index: {0}]   ;;  %s3458_s21 = inlined_call_operand.hbm [shape: f32[32,128], index: 21, kind: output, shape index: {1}]  }
   0x1   :  { %3467 = sst [smem:[#allocation10_spill]] %s3437_s0 }
   0x2   :  { %3468 = sst [smem:[#allocation11_spill]] %s3438_s1 }
   0x3   :  { %3469 = sst [smem:[#allocation12_spill]] %s3439_s2 }
   0x4   :  { %3470 = sst [smem:[#allocation13_spill]] %s3440_s3 }
   0x5   :  { %3471 = sst [smem:[#allocation14_spill]] %s3441_s4 }
   0x6   :  { %3472 = sst [smem:[#allocation15_spill]] %s3442_s5 }
   0x7   :  { %3473 = sst [smem:[#allocation16_spill]] %s3443_s6 }
   0x8   :  { %3474 = sst [smem:[#allocation17_spill]] %s3444_s7 }
   0x9   :  { %3475 = sst [smem:[#allocation18_spill]] %s3445_s8 }
   0xa   :  { %3476 = sst [smem:[#allocation19_spill]] %s3446_s9 }
   0xb   :  { %3477 = sst [smem:[#allocation20_spill]] %s3447_s10 }
   0xc   :  { %3478 = sst [smem:[#allocation21_spill]] %s3448_s11 }
   0xd   :  { %3479 = sst [smem:[#allocation22_spill]] %s3449_s12 }
   0xe   :  { %3480 = sst [smem:[#allocation23_spill]] %s3457_s20 }
   0xf   :  { %3481 = sst [smem:[#allocation24_spill]] %s3458_s21 }
  0x10   :  { %27 = vsyncpa [#allocation3], 0 }
  0x11   :  { %28 = vsyncpa [#allocation5], 0  ;;  %s3107_s2 = smov 0  }
  0x12 LB: > { %3482 = sst [smem:[#allocation8_spill]] %s2991_s2  ;;  %s3113_s25 = sadd.s32 4294967295, %s2991_s2   ;;  %s2991_s2 = sphi %s3107_s2, %s34_s2  }
  0x13   : > { %p2335_p0 = scmp.ge.s32.totalorder %s2991_s2, 1  ;;  %p700_p1 = scmp.lt.s32.totalorder %s2991_s2, 6 }
  0x15   : > { %p701_p2 = pnand %p2335_p0, %p700_p1 }
  0x17   : > { %704 = sbr.rel (%p701_p2) target bundleno = 1311 (0x51f), region = 100 }
  0x1c   : > { %p808_p3 = scmp.lt.s32.totalorder %s3113_s25, 4  ;;  %s3484_s6 = sld [smem:[#allocation16_spill]] }
  0x1d   : > { %s3485_s7 = sld [smem:[#allocation17_spill]]  ;;  %p2352_p4 = scmp.ne.s32.totalorder %s3113_s25, 0 }
  0x1e   : > { %s3119_s26 = scalar_select %p808_p3, %s3113_s25, 4 }
  0x1f   : > { %s3486_s8 = sld [smem:[#allocation18_spill]] }
  0x20   : > { %s2377_s27 = sshll.u32 %s3119_s26, 7  ;;  %s3487_s10 = sld [smem:[#allocation20_spill]] }
  0x21   : > { %s3488_s11 = sld [smem:[#allocation21_spill]]  ;;  %s846_s20 = scalar_lea.vmem %s3451_s14, %s3119_s26 }
  0x22   : > { %s3129_s30 = scalar_lea.vmem %s3484_s6, %s2377_s27  ;;  %s3489_s12 = sld [smem:[#allocation22_spill]] }
  0x23   : > { %s3134_s23 = scalar_lea.vmem %s3485_s7, %s2377_s27  ;;  %s3180_s22 = scalar_lea.vmem %s3455_s18, %s2377_s27 }
  0x24   : > { %s865_s1 = scalar_lea.vmem %s3456_s19, %s3119_s26  ;;  %s3491_s29 = sld [smem:[#allocation10_spill]] (!%p2352_p4) }
  0x25   : > { %s3139_s2 = scalar_lea.vmem %s3486_s8, %s2377_s27  ;;  %869 = sbr.rel (%p2352_p4) target bundleno = 51 (0x33), region = 104 }
  0x26   : > { %s3144_s3 = scalar_lea.vmem %s3487_s10, %s2377_s27 }
  0x27   : > { %s3149_s0 = scalar_lea.vmem %s3488_s11, %s2377_s27  ;;  %s3171_s11 = scalar_lea.vmem %s3453_s16, %s2377_s27 }
  0x28   : > { %s3154_s5 = scalar_lea.vmem %s3489_s12, %s2377_s27  ;;  %s857_s12 = scalar_lea.vmem %s3454_s17, %s3119_s26 }
  0x29   : > { %3490 = sst [smem:[#allocation9_spill]] %s3154_s5 }
  0x2a   : > { %v870_v0 = vld [vmem:[%s3491_s29] sm:$0xff]  ;;  %v871_v1 = vld [vmem:[%s3491_s29 + $0x8] sm:$0xff]  ;;  %s3492_s5 = sld [smem:[#allocation11_spill]] }
  0x2b   : > { %872 = vst [vmem:[#allocation2] sm:$0xff] %v870_v0  ;;  %873 = vst [vmem:[#allocation2 + $0x8] sm:$0xff] %v871_v1 }
  0x30   : > { %v874_v2 = vld [vmem:[%s3492_s5] sm:$0xff]  ;;  %v875_v3 = vld [vmem:[%s3492_s5 + $0x8] sm:$0xff]  ;;  %v876_v4 = vld [vmem:[%s3492_s5 + $0x10] sm:$0xff] }
  0x31   : > { %878 = vst [vmem:[#allocation4] sm:$0xff] %v874_v2  ;;  %v877_v5 = vld [vmem:[%s3492_s5 + $0x18] sm:$0xff]  ;;  %879 = vst [vmem:[#allocation4 + $0x8] sm:$0xff] %v875_v3 }
  0x32   : > { %880 = vst [vmem:[#allocation4 + $0x10] sm:$0xff] %v876_v4  ;;  %881 = vst [vmem:[#allocation4 + $0x18] sm:$0xff] %v877_v5 }
  0x33 PF: > { %v883_v6 = vld [vmem:[#allocation2 + $0x8] sm:$0xff]  ;;  %v882_v7 = vld [vmem:[#allocation2] sm:$0xff]  ;;  %s3493_s6 = sld [smem:[#allocation12_spill]]  ;;  %vm892_vm0 = vcmask 130048   ;;  %v1122_v14 = vld [vmem:[%s3134_s23 + $0x78] sm:$0xff]  ;;  %vm1753_vm1 = vcmask 261120   ;;  %s3501_s28 = scalar_lea.vmem %s3452_s15, %s3119_s26 }
  0x34   : > { %2565 = vmatprep.subr.mxu0 %v883_v6  ;;  %2575 = vmatprep.subr.mxu1 %v883_v6  ;;  %s3494_s7 = sld [smem:[#allocation13_spill]]  ;;  %v1121_v17 = vld [vmem:[%s3134_s23 + $0x70] sm:$0xff]  ;;  %v1106_v19 = vld [vmem:[%s3129_s30 + $0x78] sm:$0xff]  ;;  %v1120_v20 = vld [vmem:[%s3134_s23 + $0x68] sm:$0xff]  ;;  %p2913_p5 = scmp.eq.s32.totalorder %s3113_s25, 4 }
  0x35   : > { %2566 = vmatpush3.msra.mxu0 %v883_v6  ;;  %2576 = vmatpush3.msra.mxu1 %v883_v6  ;;  %v1105_v21 = vld [vmem:[%s3129_s30 + $0x70] sm:$0xff]  ;;  %v1119_v22 = vld [vmem:[%s3134_s23 + $0x60] sm:$0xff]  ;;  %v1104_v23 = vld [vmem:[%s3129_s30 + $0x68] sm:$0xff]  ;;  %s3498_s4 = sld [smem:[#allocation14_spill]]  ;;  %s2993_s21 = smov [#allocation4]  }
  0x36   : > { %2567 = vmatprep.subr.mxu0 %v882_v7  ;;  %2577 = vmatprep.subr.mxu1 %v882_v7  ;;  %v1118_v24 = vld [vmem:[%s3134_s23 + $0x58] sm:$0xff]  ;;  %v1103_v25 = vld [vmem:[%s3129_s30 + $0x60] sm:$0xff]  ;;  %v1117_v26 = vld [vmem:[%s3134_s23 + $0x50] sm:$0xff]  ;;  %s3499_s24 = sld [smem:[#allocation15_spill]] }
  0x37   : > { %2568 = vmatpush3.msra.mxu0 %v882_v7  ;;  %2578 = vmatpush3.msra.mxu1 %v882_v7  ;;  %v1102_v27 = vld [vmem:[%s3129_s30 + $0x58] sm:$0xff]  ;;  %v1116_v28 = vld [vmem:[%s3134_s23 + $0x48] sm:$0xff]  ;;  %v1101_v29 = vld [vmem:[%s3129_s30 + $0x50] sm:$0xff] }
  0x38   : > { %2585 = vmatprep.subr.mxu0 %v1122_v14  ;;  %v884_v18 = vld [vmem:[#allocation4] sm:$0xff]  ;;  %2623 = vmatprep.subr.mxu1 %v1106_v19  ;;  %v1115_v30 = vld [vmem:[%s3134_s23 + $0x40] sm:$0xff]  ;;  %v1100_v31 = vld [vmem:[%s3129_s30 + $0x48] sm:$0xff] }
  0x39   : > { %v888_v8 = vld [vmem:[%s3493_s6] sm:$0xff]  ;;  %v889_v10 = vld [vmem:[%s3493_s6 + $0x8] sm:$0xff]  ;;  %v890_v12 = vld [vmem:[%s3493_s6 + $0x10] sm:$0xff] }
  0x3a   : > { %v990_v9 = vld [vmem:[%s3494_s7] sm:$0xff]  ;;  %v991_v11 = vld [vmem:[%s3494_s7 + $0x8] sm:$0xff]  ;;  %2569 = vmatprep.mubr.msk.f32.mxu0 %vm892_vm0, %v888_v8  ;;  %v992_v13 = vld [vmem:[%s3494_s7 + $0x10] sm:$0xff] }
  0x3b   : > { %2579 = vmatprep.mubr.msk.f32.mxu1 %vm892_vm0, %v990_v9  ;;  %2570 = vmatmul.mubr.msk.f32.vlgmr.msra.gmra.mxu0 %vm892_vm0, %v889_v10  ;;  %v891_v15 = vld [vmem:[%s3493_s6 + $0x18] sm:$0xff]  ;;  %v1099_v33 = vld [vmem:[%s3129_s30 + $0x40] sm:$0xff]  ;;  %v1113_v34 = vld [vmem:[%s3134_s23 + $0x30] sm:$0xff] }
  0x3c   : > { %2580 = vmatmul.mubr.msk.f32.vlgmr.msra.gmra.mxu1 %vm892_vm0, %v991_v11  ;;  %2572 = vmatprep.mubr.msk.f32.mxu0 %vm892_vm0, %v890_v12  ;;  %v993_v16 = vld [vmem:[%s3494_s7 + $0x18] sm:$0xff]  ;;  %v1112_v36 = vld [vmem:[%s3134_s23 + $0x28] sm:$0xff]  ;;  %v1097_v37 = vld [vmem:[%s3129_s30 + $0x30] sm:$0xff] }
  0x3d   : > { %2582 = vmatprep.mubr.msk.f32.mxu1 %vm892_vm0, %v992_v13  ;;  %2586 = vmatpush3.msra.mxu0 %v1122_v14  ;;  %v1114_v32 = vld [vmem:[%s3134_s23 + $0x38] sm:$0xff]  ;;  %v1111_v38 = vld [vmem:[%s3134_s23 + $0x20] sm:$0xff]  ;;  %v1096_v39 = vld [vmem:[%s3129_s30 + $0x28] sm:$0xff] }
  0x3e   : > { %2587 = vmatprep.subr.mxu0 %v1121_v17  ;;  %2624 = vmatpush3.msra.mxu1 %v1106_v19  ;;  %v1098_v35 = vld [vmem:[%s3129_s30 + $0x38] sm:$0xff]  ;;  %v1095_v41 = vld [vmem:[%s3129_s30 + $0x20] sm:$0xff]  ;;  %v1109_v42 = vld [vmem:[%s3134_s23 + $0x10] sm:$0xff] }
  0x3f   : > { %2573 = vmatmul.mubr.msk.f32.gmra.mxu0 %vm892_vm0, %v891_v15  ;;  %2625 = vmatprep.subr.mxu1 %v1105_v21  ;;  %v1110_v40 = vld [vmem:[%s3134_s23 + $0x18] sm:$0xff]  ;;  %v1108_v44 = vld [vmem:[%s3134_s23 + $0x8] sm:$0xff]  ;;  %v1093_v45 = vld [vmem:[%s3129_s30 + $0x10] sm:$0xff] }
  0x40   : > { %2583 = vmatmul.mubr.msk.f32.gmra.mxu1 %vm892_vm0, %v993_v16  ;;  %2617 = vmatprep.mubr.f32.mxu0 %v884_v18  ;;  %v1094_v43 = vld [vmem:[%s3129_s30 + $0x18] sm:$0xff]  ;;  %v1107_v46 = vld [vmem:[%s3134_s23] sm:$0xff]  ;;  %v1307_v50 = vld [vmem:[%s3139_s2 + $0x70] sm:$0xff]  ;;  %s3500_s23 = scalar_lea.vmem %s3450_s13, %s3119_s26 }
  0x41   : > { %2588 = vmatpush3.msra.mxu0 %v1121_v17  ;;  %2626 = vmatpush3.msra.mxu1 %v1105_v21  ;;  %v1308_v47 = vld [vmem:[%s3139_s2 + $0x78] sm:$0xff]  ;;  %v886_v49 = vld [vmem:[#allocation4 + $0x10] sm:$0xff]  ;;  %v1306_v51 = vld [vmem:[%s3139_s2 + $0x68] sm:$0xff] }
  0x42   : > { %2589 = vmatprep.subr.mxu0 %v1120_v20  ;;  %2627 = vmatprep.subr.mxu1 %v1104_v23  ;;  %v885_v48 = vld [vmem:[#allocation4 + $0x8] sm:$0xff]  ;;  %v1305_v52 = vld [vmem:[%s3139_s2 + $0x60] sm:$0xff]  ;;  %v1303_v54 = vld [vmem:[%s3139_s2 + $0x50] sm:$0xff] }
  0x43   : > { %2590 = vmatpush3.msra.mxu0 %v1120_v20  ;;  %2628 = vmatpush3.msra.mxu1 %v1104_v23  ;;  %v1304_v53 = vld [vmem:[%s3139_s2 + $0x58] sm:$0xff]  ;;  %v1302_v55 = vld [vmem:[%s3139_s2 + $0x48] sm:$0xff]  ;;  %v1301_v56 = vld [vmem:[%s3139_s2 + $0x40] sm:$0xff] }
  0x44   : > { %2591 = vmatprep.subr.mxu0 %v1119_v22  ;;  %2629 = vmatprep.subr.mxu1 %v1103_v25  ;;  %v1300_v57 = vld [vmem:[%s3139_s2 + $0x38] sm:$0xff]  ;;  %v1299_v58 = vld [vmem:[%s3139_s2 + $0x30] sm:$0xff]  ;;  %v1298_v59 = vld [vmem:[%s3139_s2 + $0x28] sm:$0xff] }
  0x45   : > { %2592 = vmatpush3.msra.mxu0 %v1119_v22  ;;  %2630 = vmatpush3.msra.mxu1 %v1103_v25  ;;  %v1297_v60 = vld [vmem:[%s3139_s2 + $0x20] sm:$0xff]  ;;  %v1296_v61 = vld [vmem:[%s3139_s2 + $0x18] sm:$0xff]  ;;  %v1295_v62 = vld [vmem:[%s3139_s2 + $0x10] sm:$0xff] }
  0x46   : > { %2593 = vmatprep.subr.mxu0 %v1118_v24  ;;  %2631 = vmatprep.subr.mxu1 %v1102_v27  ;;  %v887_v63 = vld [vmem:[#allocation4 + $0x18] sm:$0xff]  ;;  %v1091_v2 = vld [vmem:[%s3129_s30] sm:$0xff]  ;;  %v1428_v4 = vld [vmem:[%s3144_s3 + $0x78] sm:$0xff] }
  0x47   : > { %2594 = vmatpush3.msra.mxu0 %v1118_v24  ;;  %2632 = vmatpush3.msra.mxu1 %v1102_v27  ;;  %v1092_v0 = vld [vmem:[%s3129_s30 + $0x8] sm:$0xff]  ;;  %v1293_v3 = vld [vmem:[%s3139_s2] sm:$0xff]  ;;  %v1540_v5 = vld [vmem:[%s3149_s0 + $0x78] sm:$0xff] }
  0x48   : > { %2595 = vmatprep.subr.mxu0 %v1117_v26  ;;  %2633 = vmatprep.subr.mxu1 %v1101_v29  ;;  %v1294_v1 = vld [vmem:[%s3139_s2 + $0x8] sm:$0xff]  ;;  %v1427_v10 = vld [vmem:[%s3144_s3 + $0x70] sm:$0xff]  ;;  %v1425_v18 = vld [vmem:[%s3144_s3 + $0x60] sm:$0xff]  ;;  %s3495_s2 = sld [smem:[#allocation9_spill]] }
  0x49   : > { %2596 = vmatpush3.msra.mxu0 %v1117_v26  ;;  %2634 = vmatpush3.msra.mxu1 %v1101_v29  ;;  %v1539_v11 = vld [vmem:[%s3149_s0 + $0x70] sm:$0xff]  ;;  %v1426_v16 = vld [vmem:[%s3144_s3 + $0x68] sm:$0xff]  ;;  %v1537_v19 = vld [vmem:[%s3149_s0 + $0x60] sm:$0xff] }
  0x4a   : > { %2597 = vmatprep.subr.mxu0 %v1116_v28  ;;  %2635 = vmatprep.subr.mxu1 %v1100_v31  ;;  %v1538_v17 = vld [vmem:[%s3149_s0 + $0x68] sm:$0xff]  ;;  %v1424_v20 = vld [vmem:[%s3144_s3 + $0x58] sm:$0xff]  ;;  %v1423_v22 = vld [vmem:[%s3144_s3 + $0x50] sm:$0xff] }
  0x4b   : > { %2598 = vmatpush3.msra.mxu0 %v1116_v28  ;;  %2636 = vmatpush3.msra.mxu1 %v1100_v31  ;;  %v1536_v21 = vld [vmem:[%s3149_s0 + $0x58] sm:$0xff]  ;;  %v1535_v23 = vld [vmem:[%s3149_s0 + $0x50] sm:$0xff]  ;;  %v1422_v24 = vld [vmem:[%s3144_s3 + $0x48] sm:$0xff] }
  0x4c   : > { %2599 = vmatprep.subr.mxu0 %v1115_v30  ;;  %2637 = vmatprep.subr.mxu1 %v1099_v33  ;;  %v1534_v25 = vld [vmem:[%s3149_s0 + $0x48] sm:$0xff]  ;;  %v1421_v26 = vld [vmem:[%s3144_s3 + $0x40] sm:$0xff]  ;;  %v1420_v28 = vld [vmem:[%s3144_s3 + $0x38] sm:$0xff] }
  0x4d   : > { %2600 = vmatpush3.msra.mxu0 %v1115_v30  ;;  %2638 = vmatpush3.msra.mxu1 %v1099_v33  ;;  %v1533_v27 = vld [vmem:[%s3149_s0 + $0x40] sm:$0xff]  ;;  %v1532_v29 = vld [vmem:[%s3149_s0 + $0x38] sm:$0xff]  ;;  %v1419_v30 = vld [vmem:[%s3144_s3 + $0x30] sm:$0xff] }
  0x4e   : > { %2601 = vmatprep.subr.mxu0 %v1114_v32  ;;  %2639 = vmatprep.subr.mxu1 %v1098_v35  ;;  %v1531_v31 = vld [vmem:[%s3149_s0 + $0x30] sm:$0xff]  ;;  %v1530_v33 = vld [vmem:[%s3149_s0 + $0x28] sm:$0xff] }
  0x4f   : > { %2602 = vmatpush3.msra.mxu0 %v1114_v32  ;;  %2640 = vmatpush3.msra.mxu1 %v1098_v35  ;;  %v1418_v32 = vld [vmem:[%s3144_s3 + $0x28] sm:$0xff]  ;;  %v1529_v35 = vld [vmem:[%s3149_s0 + $0x20] sm:$0xff] }
  0x50   : > { %2603 = vmatprep.subr.mxu0 %v1113_v34  ;;  %2641 = vmatprep.subr.mxu1 %v1097_v37 }
  0x51   : > { %2604 = vmatpush3.msra.mxu0 %v1113_v34  ;;  %2642 = vmatpush3.msra.mxu1 %v1097_v37  ;;  %v1417_v34 = vld [vmem:[%s3144_s3 + $0x20] sm:$0xff]  ;;  %v1528_v37 = vld [vmem:[%s3149_s0 + $0x18] sm:$0xff] }
  0x52   : > { %2605 = vmatprep.subr.mxu0 %v1112_v36  ;;  %2643 = vmatprep.subr.mxu1 %v1096_v39 }
  0x53   : > { %2606 = vmatpush3.msra.mxu0 %v1112_v36  ;;  %2644 = vmatpush3.msra.mxu1 %v1096_v39  ;;  %v1416_v36 = vld [vmem:[%s3144_s3 + $0x18] sm:$0xff]  ;;  %v1527_v39 = vld [vmem:[%s3149_s0 + $0x10] sm:$0xff] }
  0x54   : > { %2607 = vmatprep.subr.mxu0 %v1111_v38  ;;  %2645 = vmatprep.subr.mxu1 %v1095_v41 }
  0x55   : > { %2608 = vmatpush3.msra.mxu0 %v1111_v38  ;;  %2646 = vmatpush3.msra.mxu1 %v1095_v41  ;;  %v1415_v38 = vld [vmem:[%s3144_s3 + $0x10] sm:$0xff]  ;;  %v1526_v41 = vld [vmem:[%s3149_s0 + $0x8] sm:$0xff] }
  0x56   : > { %2609 = vmatprep.subr.mxu0 %v1110_v40  ;;  %2647 = vmatprep.subr.mxu1 %v1094_v43 }
  0x57   : > { %2610 = vmatpush3.msra.mxu0 %v1110_v40  ;;  %2648 = vmatpush3.msra.mxu1 %v1094_v43  ;;  %v1414_v40 = vld [vmem:[%s3144_s3 + $0x8] sm:$0xff]  ;;  %v1525_v43 = vld [vmem:[%s3149_s0] sm:$0xff] }
  0x58   : > { %2611 = vmatprep.subr.mxu0 %v1109_v42  ;;  %2649 = vmatprep.subr.mxu1 %v1093_v45 }
  0x59   : > { %2612 = vmatpush3.msra.mxu0 %v1109_v42  ;;  %2650 = vmatpush3.msra.mxu1 %v1093_v45  ;;  %v1413_v42 = vld [vmem:[%s3144_s3] sm:$0xff]  ;;  %s3496_s3 = sld [smem:[#allocation19_spill]] }
  0x5a   : > { %2613 = vmatprep.subr.mxu0 %v1108_v44  ;;  %2651 = vmatprep.subr.mxu1 %v1092_v0 }
  0x5b   : > { %2614 = vmatpush3.msra.mxu0 %v1108_v44  ;;  %2652 = vmatpush3.msra.mxu1 %v1092_v0  ;;  %v1652_v44 = vld [vmem:[%s3495_s2 + $0x78] sm:$0xff] }
  0x5c   : > { %2615 = vmatprep.subr.mxu0 %v1107_v46  ;;  %2653 = vmatprep.subr.mxu1 %v1091_v2 }
  0x5d   : > { %2616 = vmatpush3.msra.mxu0 %v1107_v46  ;;  %2654 = vmatpush3.msra.mxu1 %v1091_v2 }
  0x5e   : > { %2661 = vmatprep.subr.mxu0 %v1308_v47  ;;  %2618 = vmatmul.mubr.f32.vlgmr.msra.gmra.mxu0 %v885_v48 }
  0x5f   : > { %2662 = vmatpush3.msra.mxu0 %v1308_v47  ;;  %2620 = vmatprep.mubr.f32.mxu0 %v886_v49  ;;  %s3497_s0 = scalar_lea.vmem %s3496_s3, %s3119_s26 }
  0x60   : > { %2663 = vmatprep.subr.mxu0 %v1307_v50  ;;  %2699 = vmatprep.subr.mxu1 %v1428_v4 }
  0x61   : > { %2664 = vmatpush3.msra.mxu0 %v1307_v50 }
  0x62   : > { %2665 = vmatprep.subr.mxu0 %v1306_v51  ;;  %2621 = vmatmul.mubr.f32.gmra.mxu0 %v887_v63 }
  0x63   : > { %2666 = vmatpush3.msra.mxu0 %v1306_v51 }
  0x64   : > { %2667 = vmatprep.subr.mxu0 %v1305_v52 }
  0x65   : > { %2668 = vmatpush3.msra.mxu0 %v1305_v52 }
  0x66   : > { %2669 = vmatprep.subr.mxu0 %v1304_v53 }
  0x67   : > { %2670 = vmatpush3.msra.mxu0 %v1304_v53 }
  0x68   : > { %2671 = vmatprep.subr.mxu0 %v1303_v54 }
  0x69   : > { %2672 = vmatpush3.msra.mxu0 %v1303_v54 }
  0x6a   : > { %2673 = vmatprep.subr.mxu0 %v1302_v55 }
  0x6b   : > { %2674 = vmatpush3.msra.mxu0 %v1302_v55  ;;  %v2361_v55 = vld [vmem:[%s3497_s0] ss:$0 sm:$0xff] }
  0x6c   : > { %2675 = vmatprep.subr.mxu0 %v1301_v56 }
  0x6d   : > { %2676 = vmatpush3.msra.mxu0 %v1301_v56 }
  0x6e   : > { %2677 = vmatprep.subr.mxu0 %v1300_v57 }
  0x6f   : > { %2678 = vmatpush3.msra.mxu0 %v1300_v57 }
  0x70   : > { %2679 = vmatprep.subr.mxu0 %v1299_v58 }
  0x71   : > { %2680 = vmatpush3.msra.mxu0 %v1299_v58 }
  0x72   : > { %2681 = vmatprep.subr.mxu0 %v1298_v59 }
  0x73   : > { %2682 = vmatpush3.msra.mxu0 %v1298_v59 }
  0x74   : > { %2683 = vmatprep.subr.mxu0 %v1297_v60 }
  0x75   : > { %2684 = vmatpush3.msra.mxu0 %v1297_v60 }
  0x76   : > { %2685 = vmatprep.subr.mxu0 %v1296_v61 }
  0x77   : > { %2686 = vmatpush3.msra.mxu0 %v1296_v61 }
  0x78   : > { %2687 = vmatprep.subr.mxu0 %v1295_v62 }
  0x79   : > { %2688 = vmatpush3.msra.mxu0 %v1295_v62 }
  0x7a   : > { %2689 = vmatprep.subr.mxu0 %v1294_v1 }
  0x7b   : > { %2690 = vmatpush3.msra.mxu0 %v1294_v1 }
  0x7c   : > { %2691 = vmatprep.subr.mxu0 %v1293_v3 }
  0x7d   : > { %2692 = vmatpush3.msra.mxu0 %v1293_v3 }
  0x7e   : > { %2737 = vmatprep.subr.mxu0 %v1540_v5 }
  0xfb   : > { %v2571_v6 = vpop.f32.mrf.mxu0 }
  0xfc   : > { %v2581_v7 = vpop.f32.mrf.mxu1 }
  0xfd   : > { %v971_v8 = vpop.f32.mrf.mxu0 }
  0xfe   : > { %v1072_v9 = vpop.f32.mrf.mxu1  ;;  %2655 = vmatprep.mubr.f32.mxu1 %v971_v8  ;;  %v1651_v8 = vld [vmem:[%s3495_s2 + $0x70] sm:$0xff] }
  0xff   : > { %2693 = vmatprep.mubr.f32.mxu0 %v1072_v9  ;;  %v2574_v12 = vpop.f32.mrf.mxu0  ;;  %2656 = vmatmul.mubr.f32.vlgmr.msra.gmra.mxu1 %v2571_v6 }
 0x100   : > { %2694 = vmatmul.mubr.f32.vlgmr.msra.gmra.mxu0 %v2581_v7  ;;  %v2584_v13 = vpop.f32.mrf.mxu1  ;;  %2700 = vmatpush3.msra.mxu1 %v1428_v4 }
 0x101   : > { %2738 = vmatpush3.msra.mxu0 %v1540_v5  ;;  %v981_v14 = vpop.f32.mrf.mxu0  ;;  %2701 = vmatprep.subr.mxu1 %v1427_v10 }
 0x102   : > { %v1082_v15 = vpop.f32.mrf.mxu1  ;;  %2739 = vmatprep.subr.mxu0 %v1539_v11  ;;  %2658 = vmatprep.mubr.f32.mxu1 %v981_v14  ;;  %v1647_v14 = vld [vmem:[%s3495_s2 + $0x50] sm:$0xff] }
 0x103   : > { %2696 = vmatprep.mubr.f32.mxu0 %v1082_v15  ;;  %2659 = vmatmul.mubr.f32.gmra.mxu1 %v2574_v12  ;;  %v1649_v12 = vld [vmem:[%s3495_s2 + $0x60] sm:$0xff]  ;;  %v1646_v15 = vld [vmem:[%s3495_s2 + $0x48] sm:$0xff] }
 0x104   : > { %2697 = vmatmul.mubr.f32.gmra.mxu0 %v2584_v13  ;;  %2702 = vmatpush3.msra.mxu1 %v1427_v10  ;;  %v1650_v10 = vld [vmem:[%s3495_s2 + $0x68] sm:$0xff]  ;;  %v1648_v13 = vld [vmem:[%s3495_s2 + $0x58] sm:$0xff] }
 0x105   : > { %2740 = vmatpush3.msra.mxu0 %v1539_v11  ;;  %2703 = vmatprep.subr.mxu1 %v1426_v16 }
 0x106   : > { %2741 = vmatprep.subr.mxu0 %v1538_v17  ;;  %2704 = vmatpush3.msra.mxu1 %v1426_v16  ;;  %v1645_v16 = vld [vmem:[%s3495_s2 + $0x40] sm:$0xff] }
 0x107   : > { %2742 = vmatpush3.msra.mxu0 %v1538_v17  ;;  %2705 = vmatprep.subr.mxu1 %v1425_v18  ;;  %v1644_v17 = vld [vmem:[%s3495_s2 + $0x38] sm:$0xff] }
 0x108   : > { %2743 = vmatprep.subr.mxu0 %v1537_v19  ;;  %2706 = vmatpush3.msra.mxu1 %v1425_v18  ;;  %v1643_v18 = vld [vmem:[%s3495_s2 + $0x30] sm:$0xff] }
 0x109   : > { %2744 = vmatpush3.msra.mxu0 %v1537_v19  ;;  %2707 = vmatprep.subr.mxu1 %v1424_v20  ;;  %v1642_v19 = vld [vmem:[%s3495_s2 + $0x28] sm:$0xff] }
 0x10a   : > { %2745 = vmatprep.subr.mxu0 %v1536_v21  ;;  %2708 = vmatpush3.msra.mxu1 %v1424_v20  ;;  %v1641_v20 = vld [vmem:[%s3495_s2 + $0x20] sm:$0xff] }
 0x10b   : > { %2746 = vmatpush3.msra.mxu0 %v1536_v21  ;;  %2709 = vmatprep.subr.mxu1 %v1423_v22  ;;  %v1640_v21 = vld [vmem:[%s3495_s2 + $0x18] sm:$0xff] }
 0x10c   : > { %2747 = vmatprep.subr.mxu0 %v1535_v23  ;;  %2710 = vmatpush3.msra.mxu1 %v1423_v22  ;;  %v1639_v22 = vld [vmem:[%s3495_s2 + $0x10] sm:$0xff] }
 0x10d   : > { %2748 = vmatpush3.msra.mxu0 %v1535_v23  ;;  %2711 = vmatprep.subr.mxu1 %v1422_v24  ;;  %v1638_v23 = vld [vmem:[%s3495_s2 + $0x8] sm:$0xff] }
 0x10e   : > { %2749 = vmatprep.subr.mxu0 %v1534_v25  ;;  %2712 = vmatpush3.msra.mxu1 %v1422_v24  ;;  %v1637_v24 = vld [vmem:[%s3495_s2] sm:$0xff]  ;;  %s2141_s2 = sshll.u32 %s2993_s21, 4  ;;  %s2142_s2 = int_to_ptr.vmem [resolvable:$true] %s2141_s2 }
 0x10f   : > { %2750 = vmatpush3.msra.mxu0 %v1534_v25  ;;  %2713 = vmatprep.subr.mxu1 %v1421_v26  ;;  %v1749_v25 = vld [vmem:[%s3498_s4] sm:$0xff]  ;;  %p2936_p9 = scmp.lt.s32.totalorder %s2142_s2, %s2142_s2 }
 0x110   : > { %2751 = vmatprep.subr.mxu0 %v1533_v27  ;;  %2714 = vmatpush3.msra.mxu1 %v1421_v26  ;;  %v1751_v26 = vld [vmem:[%s3499_s24] sm:$0xff] }
 0x111   : > { %2752 = vmatpush3.msra.mxu0 %v1533_v27  ;;  %2715 = vmatprep.subr.mxu1 %v1420_v28  ;;  %v2363_v27 = vld [vmem:[%s846_s20] ss:$0 sm:$0xff] }
 0x112   : > { %2753 = vmatprep.subr.mxu0 %v1532_v29  ;;  %2716 = vmatpush3.msra.mxu1 %v1420_v28 }
 0x113   : > { %2754 = vmatpush3.msra.mxu0 %v1532_v29  ;;  %2717 = vmatprep.subr.mxu1 %v1419_v30 }
 0x114   : > { %2755 = vmatprep.subr.mxu0 %v1531_v31  ;;  %2718 = vmatpush3.msra.mxu1 %v1419_v30 }
 0x115   : > { %2756 = vmatpush3.msra.mxu0 %v1531_v31  ;;  %2719 = vmatprep.subr.mxu1 %v1418_v32 }
 0x116   : > { %2720 = vmatpush3.msra.mxu1 %v1418_v32  ;;  %2757 = vmatprep.subr.mxu0 %v1530_v33 }
 0x117   : > { %2721 = vmatprep.subr.mxu1 %v1417_v34  ;;  %2758 = vmatpush3.msra.mxu0 %v1530_v33 }
 0x118   : > { %2722 = vmatpush3.msra.mxu1 %v1417_v34  ;;  %2759 = vmatprep.subr.mxu0 %v1529_v35 }
 0x119   : > { %2723 = vmatprep.subr.mxu1 %v1416_v36  ;;  %2760 = vmatpush3.msra.mxu0 %v1529_v35  ;;  %v2362_v35 = vld [vmem:[%s3500_s23] ss:$0 sm:$0xff] }
 0x11a   : > { %2724 = vmatpush3.msra.mxu1 %v1416_v36  ;;  %2761 = vmatprep.subr.mxu0 %v1528_v37 }
 0x11b   : > { %2725 = vmatprep.subr.mxu1 %v1415_v38  ;;  %2762 = vmatpush3.msra.mxu0 %v1528_v37 }
 0x11c   : > { %2726 = vmatpush3.msra.mxu1 %v1415_v38  ;;  %2763 = vmatprep.subr.mxu0 %v1527_v39 }
 0x11d   : > { %2727 = vmatprep.subr.mxu1 %v1414_v40  ;;  %2764 = vmatpush3.msra.mxu0 %v1527_v39 }
 0x11e   : > { %2728 = vmatpush3.msra.mxu1 %v1414_v40  ;;  %2765 = vmatprep.subr.mxu0 %v1526_v41  ;;  %v2619_v45 = vpop.f32.mrf.mxu0 }
 0x11f   : > { %2729 = vmatprep.subr.mxu1 %v1413_v42  ;;  %2766 = vmatpush3.msra.mxu0 %v1526_v41 }
 0x120   : > { %2730 = vmatpush3.msra.mxu1 %v1413_v42  ;;  %2767 = vmatprep.subr.mxu0 %v1525_v43  ;;  %v1189_v46 = vpop.f32.mrf.mxu0 }
 0x121   : > { %2768 = vmatpush3.msra.mxu0 %v1525_v43  ;;  %2775 = vmatprep.subr.mxu1 %v1652_v44 }
 0x122   : > { %v2622_v47 = vpop.f32.mrf.mxu0 }
 0x124   : > { %v1199_v48 = vpop.f32.mrf.mxu0 }
 0x1bf   : > { %v2657_v49 = vpop.f32.mrf.mxu1 }
 0x1c0   : > { %v2695_v50 = vpop.f32.mrf.mxu0  ;;  %v1280_v51 = vadd.f32 %v2657_v49, %v2619_v45 }
 0x1c1   : > { %v1274_v52 = vpop.f32.mrf.mxu1 }
 0x1c2   : > { %v1375_v53 = vpop.f32.mrf.mxu0  ;;  %v1395_v54 = vadd.f32 %v2695_v50, %v1280_v51  ;;  %v1275_v56 = vadd.f32 %v1274_v52, %v1189_v46 }
 0x1c3   : > { %v2660_v57 = vpop.f32.mrf.mxu1 }
 0x1c4   : > { %v2698_v58 = vpop.f32.mrf.mxu0  ;;  %v1394_v59 = vadd.f32 %v1375_v53, %v1275_v56  ;;  %v1290_v60 = vadd.f32 %v2660_v57, %v2622_v47  ;;  %v1406_v61 = vadd.f32 %v2361_v55, %v1395_v54  ;;  %v1750_v53 = vld [vmem:[%s3498_s4 + $0x8] sm:$0xff]  ;;  %v2364_v56 = vld [vmem:[%s3501_s28] ss:$0 sm:$0xff] }
 0x1c5   : > { %v1284_v62 = vpop.f32.mrf.mxu1 }
 0x1c6   : > { %v1385_v63 = vpop.f32.mrf.mxu0  ;;  %v1405_v0 = vadd.f32 %v2361_v55, %v1394_v59  ;;  %v1285_v1 = vadd.f32 %v1284_v62, %v1199_v48  ;;  %v1397_v2 = vadd.f32 %v2698_v58, %v1290_v60  ;;  %v1410_v5 = vmax.f32 %v1406_v61, 0.0 }
 0x1c8   : > { %v1409_v3 = vmax.f32 %v1405_v0, 0.0  ;;  %v1396_v4 = vadd.f32 %v1385_v63, %v1285_v1  ;;  %v1408_v6 = vadd.f32 %v2361_v55, %v1397_v2 }
 0x1ca   : > { %v1407_v7 = vadd.f32 %v2361_v55, %v1396_v4  ;;  %2731 = vmatprep.mubr.f32.mxu1 %v1409_v3  ;;  %2769 = vmatprep.mubr.f32.mxu0 %v1409_v3  ;;  %v1412_v11 = vmax.f32 %v1408_v6, 0.0  ;;  %v1931_v4 = vld [vmem:[%s3171_s11 + $0x78] sm:$0xff]  ;;  %v1929_v6 = vld [vmem:[%s3171_s11 + $0x68] sm:$0xff] }
 0x1cb   : > { %2732 = vmatmul.mubr.f32.vlgmr.msra.gmra.mxu1 %v1410_v5  ;;  %2770 = vmatmul.mubr.f32.vlgmr.msra.gmra.mxu0 %v1410_v5 }
 0x1cc   : > { %v1411_v9 = vmax.f32 %v1407_v7, 0.0  ;;  %2776 = vmatpush3.msra.mxu1 %v1652_v44  ;;  %v1928_v7 = vld [vmem:[%s3171_s11 + $0x60] sm:$0xff] }
 0x1cd   : > { %2777 = vmatprep.subr.mxu1 %v1651_v8 }
 0x1ce   : > { %2778 = vmatpush3.msra.mxu1 %v1651_v8  ;;  %2734 = vmatprep.mubr.f32.mxu1 %v1411_v9  ;;  %v1927_v8 = vld [vmem:[%s3171_s11 + $0x58] sm:$0xff] }
 0x1cf   : > { %2772 = vmatprep.mubr.f32.mxu0 %v1411_v9  ;;  %2779 = vmatprep.subr.mxu1 %v1650_v10 }
 0x1d0   : > { %2735 = vmatmul.mubr.f32.gmra.mxu1 %v1412_v11  ;;  %2773 = vmatmul.mubr.f32.gmra.mxu0 %v1412_v11 }
 0x1d1   : > { %2780 = vmatpush3.msra.mxu1 %v1650_v10  ;;  %2807 = vmatprep.mubr.f32.mxu1 %v1409_v3  ;;  %v1752_v3 = vld [vmem:[%s3499_s24 + $0x8] sm:$0xff] }
 0x1d2   : > { %2781 = vmatprep.subr.mxu1 %v1649_v12  ;;  %2821 = vmatprep.mubr.msk.f32.mxu0 %vm1753_vm1, %v1751_v26  ;;  %v1925_v10 = vld [vmem:[%s3171_s11 + $0x48] sm:$0xff] }
 0x1d3   : > { %2782 = vmatpush3.msra.mxu1 %v1649_v12  ;;  %v1923_v12 = vld [vmem:[%s3171_s11 + $0x38] sm:$0xff]  ;;  %v2025_v26 = vld [vmem:[%s3180_s22 + $0x48] sm:$0xff] }
 0x1d4   : > { %2783 = vmatprep.subr.mxu1 %v1648_v13 }
 0x1d5   : > { %2784 = vmatpush3.msra.mxu1 %v1648_v13  ;;  %v1922_v13 = vld [vmem:[%s3171_s11 + $0x30] sm:$0xff] }
 0x1d6   : > { %2785 = vmatprep.subr.mxu1 %v1647_v14 }
 0x1d7   : > { %2786 = vmatpush3.msra.mxu1 %v1647_v14  ;;  %v1921_v14 = vld [vmem:[%s3171_s11 + $0x28] sm:$0xff] }
 0x1d8   : > { %2787 = vmatprep.subr.mxu1 %v1646_v15 }
 0x1d9   : > { %2788 = vmatpush3.msra.mxu1 %v1646_v15  ;;  %v1920_v15 = vld [vmem:[%s3171_s11 + $0x20] sm:$0xff] }
 0x1da   : > { %2789 = vmatprep.subr.mxu1 %v1645_v16 }
 0x1db   : > { %2790 = vmatpush3.msra.mxu1 %v1645_v16  ;;  %v1919_v16 = vld [vmem:[%s3171_s11 + $0x18] sm:$0xff] }
 0x1dc   : > { %2791 = vmatprep.subr.mxu1 %v1644_v17 }
 0x1dd   : > { %2792 = vmatpush3.msra.mxu1 %v1644_v17  ;;  %v1918_v17 = vld [vmem:[%s3171_s11 + $0x10] sm:$0xff] }
 0x1de   : > { %2793 = vmatprep.subr.mxu1 %v1643_v18 }
 0x1df   : > { %2794 = vmatpush3.msra.mxu1 %v1643_v18  ;;  %v1917_v18 = vld [vmem:[%s3171_s11 + $0x8] sm:$0xff] }
 0x1e0   : > { %2795 = vmatprep.subr.mxu1 %v1642_v19 }
 0x1e1   : > { %2796 = vmatpush3.msra.mxu1 %v1642_v19  ;;  %v1916_v19 = vld [vmem:[%s3171_s11] sm:$0xff] }
 0x1e2   : > { %2797 = vmatprep.subr.mxu1 %v1641_v20 }
 0x1e3   : > { %2798 = vmatpush3.msra.mxu1 %v1641_v20  ;;  %v2031_v20 = vld [vmem:[%s3180_s22 + $0x78] sm:$0xff] }
 0x1e4   : > { %2799 = vmatprep.subr.mxu1 %v1640_v21 }
 0x1e5   : > { %2800 = vmatpush3.msra.mxu1 %v1640_v21  ;;  %v2030_v21 = vld [vmem:[%s3180_s22 + $0x70] sm:$0xff] }
 0x1e6   : > { %2801 = vmatprep.subr.mxu1 %v1639_v22 }
 0x1e7   : > { %2802 = vmatpush3.msra.mxu1 %v1639_v22  ;;  %v2029_v22 = vld [vmem:[%s3180_s22 + $0x68] sm:$0xff] }
 0x1e8   : > { %2803 = vmatprep.subr.mxu1 %v1638_v23 }
 0x1e9   : > { %2804 = vmatpush3.msra.mxu1 %v1638_v23  ;;  %v2028_v23 = vld [vmem:[%s3180_s22 + $0x60] sm:$0xff] }
 0x1ea   : > { %2805 = vmatprep.subr.mxu1 %v1637_v24 }
 0x1eb   : > { %2806 = vmatpush3.msra.mxu1 %v1637_v24  ;;  %v2027_v24 = vld [vmem:[%s3180_s22 + $0x58] sm:$0xff] }
 0x1ec   : > { %2808 = vmatmul.mubr.f32.vlgmr.msra.gmra.mxu1 %v1410_v5  ;;  %v1930_v5 = vld [vmem:[%s3171_s11 + $0x70] sm:$0xff] }
 0x1ed   : > { %2810 = vmatprep.mubr.f32.mxu1 %v1411_v9  ;;  %v1926_v9 = vld [vmem:[%s3171_s11 + $0x50] sm:$0xff] }
 0x1f0   : > { %2811 = vmatmul.mubr.f32.gmra.mxu1 %v1412_v11  ;;  %v1924_v11 = vld [vmem:[%s3171_s11 + $0x40] sm:$0xff] }
 0x1f1   : > { %2832 = vmatprep.mubr.msk.f32.mxu1 %vm1753_vm1, %v1749_v25  ;;  %v2026_v25 = vld [vmem:[%s3180_s22 + $0x50] sm:$0xff] }
 0x28b   : > { %v2733_v28 = vpop.f32.mrf.mxu1  ;;  %v2771_v29 = vpop.f32.mrf.mxu0 }
 0x28c   : > { %v1620_v30 = vadd.f32 %v2771_v29, %v2363_v27  ;;  %v1508_v41 = vadd.f32 %v2733_v28, %v2362_v35  ;;  %v2023_v28 = vld [vmem:[%s3180_s22 + $0x38] sm:$0xff]  ;;  %v2022_v29 = vld [vmem:[%s3180_s22 + $0x30] sm:$0xff] }
 0x28d   : > { %v1502_v31 = vpop.f32.mrf.mxu1  ;;  %v1614_v32 = vpop.f32.mrf.mxu0 }
 0x28e   : > { %v1634_v33 = vmax.f32 %v1620_v30, 0.0  ;;  %v1615_v34 = vadd.f32 %v2363_v27, %v1614_v32  ;;  %v1503_v48 = vadd.f32 %v2362_v35, %v1502_v31  ;;  %v1522_v51 = vmax.f32 %v1508_v41, 0.0  ;;  %v2021_v30 = vld [vmem:[%s3180_s22 + $0x28] sm:$0xff]  ;;  %v2020_v31 = vld [vmem:[%s3180_s22 + $0x20] sm:$0xff] }
 0x28f   : > { %v2016_v41 = vld [vmem:[%s3180_s22] sm:$0xff] }
 0x290   : > { %2119 = vst [vmem:[#allocation4 + $0x8] sm:$0xff] %v1634_v33  ;;  %v1633_v36 = vmax.f32 %v1615_v34, 0.0  ;;  %v2736_v37 = vpop.f32.mrf.mxu1  ;;  %v2774_v38 = vpop.f32.mrf.mxu0  ;;  %v1521_v52 = vmax.f32 %v1503_v48, 0.0 }
 0x291   : > { %v1518_v39 = vadd.f32 %v2736_v37, %v2362_v35  ;;  %v1630_v40 = vadd.f32 %v2774_v38, %v2363_v27  ;;  %v2019_v38 = vld [vmem:[%s3180_s22 + $0x18] sm:$0xff] }
 0x292   : > { %2118 = vst [vmem:[#allocation4] sm:$0xff] %v1633_v36  ;;  %v1512_v42 = vpop.f32.mrf.mxu1  ;;  %v1624_v43 = vpop.f32.mrf.mxu0 }
 0x293   : > { %v1524_v44 = vmax.f32 %v1518_v39, 0.0  ;;  %v1636_v45 = vmax.f32 %v1630_v40, 0.0  ;;  %v1513_v46 = vadd.f32 %v2362_v35, %v1512_v42  ;;  %v1625_v47 = vadd.f32 %v2363_v27, %v1624_v43  ;;  %v2024_v27 = vld [vmem:[%s3180_s22 + $0x40] sm:$0xff]  ;;  %v2018_v39 = vld [vmem:[%s3180_s22 + $0x10] sm:$0xff]  ;;  %v2017_v40 = vld [vmem:[%s3180_s22 + $0x8] sm:$0xff]  ;;  %s2929_s22 = scalar_lea.vmem %s2142_s2, 512 }
 0x294   : > { %v2369_v42 = vld [vmem:[%s857_s12] ss:$0 sm:$0xff]  ;;  %p2930_p6 = scmp.ne.s32.totalorder %s2142_s2, %s2929_s22  ;;  %p2937_p10 = scmp.lt.s32.totalorder %s2929_s22, %s2929_s22 }
 0x295   : > { %2121 = vst [vmem:[#allocation4 + $0x18] sm:$0xff] %v1636_v45  ;;  %v1523_v49 = vmax.f32 %v1513_v46, 0.0  ;;  %v1635_v50 = vmax.f32 %v1625_v47, 0.0  ;;  %2824 = vmatprep.subr.mxu1 %v1524_v44 }
 0x296   : > { %2825 = vmatpush3.msra.mxu1 %v1524_v44  ;;  %p2931_p7 = pnand %p2930_p6, %p2913_p5  ;;  %p2938_p11 = por %p2937_p10, %p2936_p9 }
 0x297   : > { %2120 = vst [vmem:[#allocation4 + $0x10] sm:$0xff] %v1635_v50  ;;  %2826 = vmatprep.subr.mxu1 %v1523_v49 }
 0x298   : > { %2827 = vmatpush3.msra.mxu1 %v1523_v49  ;;  %p2932_p8 = pneg %p2931_p7 }
 0x299   : > { %2828 = vmatprep.subr.mxu1 %v1522_v51 }
 0x29a   : > { %2829 = vmatpush3.msra.mxu1 %v1522_v51  ;;  %p2939_p12 = pnand %p2938_p11, %p2932_p8 }
 0x29b   : > { %2830 = vmatprep.subr.mxu1 %v1521_v52 }
 0x29c   : > { %2831 = vmatpush3.msra.mxu1 %v1521_v52 }
 0x29d   : > { %2833 = vmatmul.mubr.msk.f32.vlgmr.msra.gmra.mxu1 %vm1753_vm1, %v1750_v53  ;;  %2870 = vmatprep.subr.mxu1 %v2031_v20 }
 0x29e   : > { %2871 = vmatpush3.msra.mxu1 %v2031_v20 }
 0x29f   : > { %2872 = vmatprep.subr.mxu1 %v2030_v21 }
 0x2a0   : > { %2873 = vmatpush3.msra.mxu1 %v2030_v21 }
 0x2a1   : > { %2874 = vmatprep.subr.mxu1 %v2029_v22 }
 0x2a2   : > { %2875 = vmatpush3.msra.mxu1 %v2029_v22 }
 0x2a3   : > { %2876 = vmatprep.subr.mxu1 %v2028_v23 }
 0x2a4   : > { %2877 = vmatpush3.msra.mxu1 %v2028_v23 }
 0x2a5   : > { %2878 = vmatprep.subr.mxu1 %v2027_v24 }
 0x2a6   : > { %2879 = vmatpush3.msra.mxu1 %v2027_v24 }
 0x2a7   : > { %2880 = vmatprep.subr.mxu1 %v2026_v25 }
 0x2a8   : > { %2881 = vmatpush3.msra.mxu1 %v2026_v25 }
 0x2a9   : > { %2882 = vmatprep.subr.mxu1 %v2025_v26 }
 0x2aa   : > { %2883 = vmatpush3.msra.mxu1 %v2025_v26 }
 0x2ab   : > { %2884 = vmatprep.subr.mxu1 %v2024_v27 }
 0x2ac   : > { %v2809_v54 = vpop.f32.mrf.mxu1  ;;  %2885 = vmatpush3.msra.mxu1 %v2024_v27 }
 0x2ad   : > { %v1732_v60 = vadd.f32 %v2809_v54, %v2364_v56  ;;  %2886 = vmatprep.subr.mxu1 %v2023_v28 }
 0x2ae   : > { %v1726_v55 = vpop.f32.mrf.mxu1  ;;  %2887 = vmatpush3.msra.mxu1 %v2023_v28 }
 0x2af   : > { %v1727_v63 = vadd.f32 %v2364_v56, %v1726_v55  ;;  %v1746_v1 = vmax.f32 %v1732_v60, 0.0  ;;  %2888 = vmatprep.subr.mxu1 %v2022_v29 }
 0x2b0   : > { %v2812_v57 = vpop.f32.mrf.mxu1  ;;  %2889 = vmatpush3.msra.mxu1 %v2022_v29 }
 0x2b1   : > { %v1742_v58 = vadd.f32 %v2812_v57, %v2364_v56  ;;  %v1745_v2 = vmax.f32 %v1727_v63, 0.0  ;;  %2890 = vmatprep.subr.mxu1 %v2021_v30 }
 0x2b2   : > { %v1736_v59 = vpop.f32.mrf.mxu1  ;;  %2891 = vmatpush3.msra.mxu1 %v2021_v30 }
 0x2b3   : > { %v1748_v61 = vmax.f32 %v1742_v58, 0.0  ;;  %v1737_v62 = vadd.f32 %v2364_v56, %v1736_v59  ;;  %2892 = vmatprep.subr.mxu1 %v2020_v31 }
 0x2b4   : > { %2893 = vmatpush3.msra.mxu1 %v2020_v31 }
 0x2b5   : > { %v1747_v0 = vmax.f32 %v1737_v62, 0.0  ;;  %2813 = vmatprep.subr.mxu0 %v1748_v61  ;;  %2894 = vmatprep.subr.mxu1 %v2019_v38 }
 0x2b6   : > { %2814 = vmatpush3.msra.mxu0 %v1748_v61  ;;  %2895 = vmatpush3.msra.mxu1 %v2019_v38 }
 0x2b7   : > { %2815 = vmatprep.subr.mxu0 %v1747_v0  ;;  %2896 = vmatprep.subr.mxu1 %v2018_v39 }
 0x2b8   : > { %2816 = vmatpush3.msra.mxu0 %v1747_v0  ;;  %2897 = vmatpush3.msra.mxu1 %v2018_v39 }
 0x2b9   : > { %2817 = vmatprep.subr.mxu0 %v1746_v1  ;;  %2898 = vmatprep.subr.mxu1 %v2017_v40 }
 0x2ba   : > { %2818 = vmatpush3.msra.mxu0 %v1746_v1  ;;  %2899 = vmatpush3.msra.mxu1 %v2017_v40 }
 0x2bb   : > { %2819 = vmatprep.subr.mxu0 %v1745_v2  ;;  %2900 = vmatprep.subr.mxu1 %v2016_v41 }
 0x2bc   : > { %2820 = vmatpush3.msra.mxu0 %v1745_v2  ;;  %2901 = vmatpush3.msra.mxu1 %v2016_v41 }
 0x2bd   : > { %2822 = vmatmul.mubr.msk.f32.vlgmr.msra.gmra.mxu0 %vm1753_vm1, %v1752_v3  ;;  %2835 = vmatprep.subr.mxu0 %v1931_v4 }
 0x2be   : > { %2836 = vmatpush3.msra.mxu0 %v1931_v4 }
 0x2bf   : > { %2837 = vmatprep.subr.mxu0 %v1930_v5 }
 0x2c0   : > { %2838 = vmatpush3.msra.mxu0 %v1930_v5 }
 0x2c1   : > { %2839 = vmatprep.subr.mxu0 %v1929_v6 }
 0x2c2   : > { %2840 = vmatpush3.msra.mxu0 %v1929_v6 }
 0x2c3   : > { %2841 = vmatprep.subr.mxu0 %v1928_v7 }
 0x2c4   : > { %2842 = vmatpush3.msra.mxu0 %v1928_v7 }
 0x2c5   : > { %2843 = vmatprep.subr.mxu0 %v1927_v8 }
 0x2c6   : > { %2844 = vmatpush3.msra.mxu0 %v1927_v8 }
 0x2c7   : > { %2845 = vmatprep.subr.mxu0 %v1926_v9 }
 0x2c8   : > { %2846 = vmatpush3.msra.mxu0 %v1926_v9 }
 0x2c9   : > { %2847 = vmatprep.subr.mxu0 %v1925_v10 }
 0x2ca   : > { %2848 = vmatpush3.msra.mxu0 %v1925_v10 }
 0x2cb   : > { %2849 = vmatprep.subr.mxu0 %v1924_v11 }
 0x2cc   : > { %2850 = vmatpush3.msra.mxu0 %v1924_v11 }
 0x2cd   : > { %2851 = vmatprep.subr.mxu0 %v1923_v12 }
 0x2ce   : > { %2852 = vmatpush3.msra.mxu0 %v1923_v12 }
 0x2cf   : > { %2853 = vmatprep.subr.mxu0 %v1922_v13 }
 0x2d0   : > { %2854 = vmatpush3.msra.mxu0 %v1922_v13 }
 0x2d1   : > { %2855 = vmatprep.subr.mxu0 %v1921_v14 }
 0x2d2   : > { %2856 = vmatpush3.msra.mxu0 %v1921_v14 }
 0x2d3   : > { %2857 = vmatprep.subr.mxu0 %v1920_v15 }
 0x2d4   : > { %2858 = vmatpush3.msra.mxu0 %v1920_v15 }
 0x2d5   : > { %2859 = vmatprep.subr.mxu0 %v1919_v16 }
 0x2d6   : > { %2860 = vmatpush3.msra.mxu0 %v1919_v16 }
 0x2d7   : > { %2861 = vmatprep.subr.mxu0 %v1918_v17 }
 0x2d8   : > { %2862 = vmatpush3.msra.mxu0 %v1918_v17 }
 0x2d9   : > { %2863 = vmatprep.subr.mxu0 %v1917_v18 }
 0x2da   : > { %2864 = vmatpush3.msra.mxu0 %v1917_v18 }
 0x2db   : > { %2865 = vmatprep.subr.mxu0 %v1916_v19 }
 0x2dc   : > { %2866 = vmatpush3.msra.mxu0 %v1916_v19 }
 0x35d   : > { %v2834_v32 = vpop.f32.mrf.mxu1 }
 0x35f   : > { %v1907_v34 = vpop.f32.mrf.mxu1 }
 0x37d   : > { %v2823_v33 = vpop.f32.mrf.mxu0 }
 0x37e   : > { %v1913_v37 = vadd.f32 %v2834_v32, %v2823_v33 }
 0x37f   : > { %v1826_v35 = vpop.f32.mrf.mxu0 }
 0x380   : > { %v1908_v36 = vadd.f32 %v1907_v34, %v1826_v35 }
 0x382   : > { %2867 = vmatprep.mubr.f32.mxu0 %v1908_v36 }
 0x383   : > { %2868 = vmatmul.mubr.f32.vlgmr.msra.gmra.mxu0 %v1913_v37 }
 0x443   : > { %v2869_v43 = vpop.f32.mrf.mxu0 }
 0x444   : > { %v2011_v44 = vadd.f32 %v2869_v43, %v2369_v42 }
 0x445   : > { %v2005_v45 = vpop.f32.mrf.mxu0 }
 0x446   : > { %v2006_v46 = vadd.f32 %v2369_v42, %v2005_v45  ;;  %v2015_v48 = vmax.f32 %v2011_v44, 0.0 }
 0x448   : > { %v2014_v47 = vmax.f32 %v2006_v46, 0.0 }
 0x44a   : > { %2902 = vmatprep.mubr.f32.mxu1 %v2014_v47 }
 0x44b   : > { %2903 = vmatmul.mubr.f32.vlgmr.msra.gmra.mxu1 %v2015_v48 }
 0x44c   : > { %2942 = shalt.err (!%p2939_p12)
}
 0x44d   : > { %s2994_s12 = smov 128   ;;  %s2995_s30 = smov 8   ;;  %v2370_v49 = vld [vmem:[%s865_s1] ss:$0 sm:$0xff] }
 0x44e   : > { %s3502_s3 = sld [smem:[#allocation24_spill]]  ;;  %s2996_s28 = smov [#allocation2]  }
 0x44f   : > { %s2128_s27 = sshll.u32 %s2996_s28, 4  ;;  %s2129_s27 = int_to_ptr.vmem [resolvable:$true] %s2128_s27 }
 0x450   : > { %s2953_s8 = scalar_lea.vmem %s2129_s27, 256  ;;  %p2960_p2 = scmp.lt.s32.totalorder %s2129_s27, %s2129_s27 }
 0x451   : > { %p2954_p13 = scmp.ne.s32.totalorder %s2129_s27, %s2953_s8  ;;  %p2961_p3 = scmp.lt.s32.totalorder %s2953_s8, %s2953_s8 }
 0x453   : > { %p2955_p0 = pnand %p2954_p13, %p2913_p5  ;;  %p2962_p4 = por %p2961_p3, %p2960_p2 }
 0x454   : > { %2908 = dma.vmem_to_hbm [thread:$0]  (%p2913_p5), %s2142_s2, 512, %s3502_s3, [#allocation5], %s2994_s12, %s2994_s12, %s2995_s30  }
 0x455   : > { %p2956_p1 = pneg %p2955_p0 }
 0x457   : > { %p2963_p6 = pnand %p2962_p4, %p2956_p1 }
 0x50b   : > { %v2904_v50 = vpop.f32.mrf.mxu1 }
 0x50c   : > { %v2111_v51 = vadd.f32 %v2904_v50, %v2370_v49 }
 0x50d   : > { %v2105_v52 = vpop.f32.mrf.mxu1 }
 0x50e   : > { %v2115_v53 = vmax.f32 %v2111_v51, 0.0  ;;  %v2106_v54 = vadd.f32 %v2370_v49, %v2105_v52 }
 0x510   : > { %2117 = vst [vmem:[#allocation2 + $0x8] sm:$0xff] %v2115_v53  ;;  %v2114_v55 = vmax.f32 %v2106_v54, 0.0 }
 0x512   : > { %2116 = vst [vmem:[#allocation2] sm:$0xff] %v2114_v55 }
 0x513   : > { %2966 = shalt.err (!%p2963_p6)
}
 0x514   : > { %s3503_s11 = sld [smem:[#allocation23_spill]] }
 0x51a   : > { %2906 = dma.vmem_to_hbm [thread:$0]  (%p2913_p5), %s2129_s27, 256, %s3503_s11, [#allocation3], %s2994_s12, %s2994_s12, %s2995_s30  }
 0x51b   : > { %2982 = dma.done.wait (%p2913_p5), [#allocation3], 256  }
 0x51c   : > { %2984 = vsyncadd (%p2913_p5), [#allocation3], 4294967040 }
 0x51d   : > { %2986 = dma.done.wait (%p2913_p5), [#allocation5], 512  }
 0x51e   : > { %2988 = vsyncadd (%p2913_p5), [#allocation5], 4294966784 }
 0x51f PF: > { %s3504_s10 = sld [smem:[#allocation8_spill]] }
 0x525   : > { %s34_s2 = sadd.s32 1, %s3504_s10  }
 0x526   : > { %p31_p7 = scmp.ge.s32.totalorder %s34_s2, 7  }
 0x528   :  { %33 = sbr.rel (!%p31_p7) target bundleno = 18 (0x12), region = 178 }
 0x52d   :  { %2161 = vsyncpa [#allocation3], 1 }
 0x52e   :  { %2163 = vsyncpa [#allocation3 + $0x1], 1 }
 0x52f   :  { %2164 = vsyncpa [#allocation5], 1 }

</bundles_post_ra>
